<compile_context>
chip_gen: v7x
topology: tpu7x:2x2x1
jax: 0.10.0
libtpu: 0.0.40
codegen_flags: <defaults>
</compile_context>

<pallas_src>
import functools
import math

import jax
import jax.numpy as jnp
from jax import lax
from jax.experimental import pallas as pl
from jax.experimental.pallas import tpu as pltpu


NEG_INF = -1e9


# ----------------------------- math helpers (usable inside & outside the kernel) -----------

def _layernorm(x, g, b, eps=1e-5):
    # PyTorch LayerNorm: biased variance over last dim, eps inside sqrt.
    mu = jnp.mean(x, axis=-1, keepdims=True)
    var = jnp.mean((x - mu) ** 2, axis=-1, keepdims=True)
    return (x - mu) * lax.rsqrt(var + eps) * g + b


def _block_bias(n_q, n_k, per_batch_q, per_batch_k, causal):
    """Additive attention bias for batch-folded attention:
    0 where query-row and key-row belong to the same batch element (and, if causal,
    key position <= query position), else -1e9.  Built from in-kernel iota (no DMA)."""
    rows = lax.broadcasted_iota(jnp.int32, (n_q, n_k), 0).astype(jnp.float32)
    cols = lax.broadcasted_iota(jnp.int32, (n_q, n_k), 1).astype(jnp.float32)
    rb = jnp.floor((rows + 0.5) * (1.0 / per_batch_q))     # batch id of query row
    cb = jnp.floor((cols + 0.5) * (1.0 / per_batch_k))     # batch id of key row
    ok = rb == cb
    if causal:
        ok = ok & ((cols - cb * per_batch_k) <= (rows - rb * per_batch_q))
    return jnp.where(ok, 0.0, NEG_INF)


def _masked_head_attention(q, k, v, bias, n_heads):
    """q: (N, D), k/v: (M, D), bias: (N, M) additive.
    Heads are separated with per-head lane masks on Q (scores) and V (context), which avoids
    all narrow (<128-lane) activation slices and the head concat; per-head context
    contributions land in disjoint lanes so a plain sum reassembles the concat."""
    _, d_model = q.shape
    hd = d_model // n_heads
    scale = 1.0 / math.sqrt(hd)
    kt = k.T                                                  # one 2-D transpose, hoisted
    lane = lax.broadcasted_iota(jnp.int32, (1, d_model), 1)   # hoisted out of head loop
    ctx = jnp.zeros_like(q)
    for h in range(n_heads):                                  # static unroll over heads
        hm = ((lane >= h * hd) & (lane < (h + 1) * hd)).astype(jnp.float32)
        s = jnp.dot(q * hm, kt, preferred_element_type=jnp.float32) * scale + bias
        m = jnp.max(s, axis=-1, keepdims=True)
        e = jnp.exp(s - m)
        p = e * pl.reciprocal(jnp.sum(e, axis=-1, keepdims=True), approx=True)
        ctx = ctx + jnp.dot(p, v * hm, preferred_element_type=jnp.float32)
    return ctx


# ----------------------------- Pallas kernel ------------------------------------------------

def decoder_block_kernel(B, S, Se, D, F, n_heads,
                         x_ref, enc_ref, w_ref, wff2_ref, vec_ref, out_ref):
    x = x_ref[...]                       # (B*S, D)  folded decoder activations
    enc = enc_ref[...]                   # (B*Se, D) folded encoder output
    vec = vec_ref[...]                   # (12, max(3D, F)) packed biases / LayerNorm params

    # ---- packed bias / LayerNorm rows (single small load, static slices) ----
    bqkv1 = vec[0:1, 0:3 * D]
    bo1, g1, be1 = vec[1:2, 0:D], vec[2:3, 0:D], vec[3:4, 0:D]
    bqkv2 = vec[4:5, 0:3 * D]
    bo2, g2, be2 = vec[5:6, 0:D], vec[6:7, 0:D], vec[7:8, 0:D]
    bf1 = vec[8:9, 0:F]
    bf2, g3, be3 = vec[9:10, 0:D], vec[10:11, 0:D], vec[11:12, 0:D]

    # ---- packed weight columns: [Wqkv1 | Wo1 | Wq2 | Wkv2 | Wo2 | Wf1] ----
    wqkv1 = w_ref[:, 0:3 * D]
    wo1 = w_ref[:, 3 * D:4 * D]
    wq2 = w_ref[:, 4 * D:5 * D]
    wkv2 = w_ref[:, 5 * D:7 * D]
    wo2 = w_ref[:, 7 * D:8 * D]
    wf1 = w_ref[:, 8 * D:8 * D + F]
    wf2 = wff2_ref[...]

    n_dec = B * S
    n_enc = B * Se

    # ---- masks generated in-kernel (no mask DMA) ----
    self_bias = _block_bias(n_dec, n_dec, S, S, causal=True)      # causal + batch-block
    cross_bias = _block_bias(n_dec, n_enc, S, Se, causal=False)   # batch-block only

    # ---- self attention (fused QKV matmul) + residual + norm1 (dropout1 = identity) ----
    qkv1 = jnp.dot(x, wqkv1, preferred_element_type=jnp.float32) + bqkv1
    q1, k1, v1 = qkv1[:, 0:D], qkv1[:, D:2 * D], qkv1[:, 2 * D:3 * D]
    sa = _masked_head_attention(q1, k1, v1, self_bias, n_heads)
    sa = jnp.dot(sa, wo1, preferred_element_type=jnp.float32) + bo1
    x1 = _layernorm(x + sa, g1, be1)

    # ---- cross attention (fused KV matmul, src_mask=None) + residual + norm2 ----
    q2 = jnp.dot(x1, wq2, preferred_element_type=jnp.float32) + bqkv2[:, 0:D]
    kv2 = jnp.dot(enc, wkv2, preferred_element_type=jnp.float32) + bqkv2[:, D:3 * D]
    k2, v2 = kv2[:, 0:D], kv2[:, D:2 * D]
    ca = _masked_head_attention(q2, k2, v2, cross_bias, n_heads)
    ca = jnp.dot(ca, wo2, preferred_element_type=jnp.float32) + bo2
    x2 = _layernorm(x1 + ca, g2, be2)

    # ---- feedforward: Linear -> ReLU -> (Dropout=identity) -> Linear, residual + norm3 ----
    hidden = jnp.maximum(jnp.dot(x2, wf1, preferred_element_type=jnp.float32) + bf1, 0.0)
    ff = jnp.dot(hidden, wf2, preferred_element_type=jnp.float32) + bf2
    x3 = _layernorm(x2 + ff, g3, be3)

    # ---- single packed output (one DMA channel): [block out, past K, past V] ----
    out_ref[0] = x3
    out_ref[1] = k1          # new_past_key_value = (K_proj, V_proj) of the self-attention
    out_ref[2] = v1


# ----------------------------- wrapper: host-side packing + pallas_call ---------------------

def transformer_decoder_block(x, encoder_output, params, n_heads):
    B, S, D = x.shape
    _, Se, _ = encoder_output.shape
    (wq1, bq1, wk1, bk1, wv1, bv1, wo1, bo1, g1, be1,
     wq2, bq2, wk2, bk2, wv2, bv2, wo2, bo2, g2, be2,
     wf1, bf1, wf2, bf2, g3, be3) = params
    F = wf1.shape[1]

    # ---- pack 26 parameter tensors into 3 buffers ----
    w_pack = jnp.concatenate(
        [wq1, wk1, wv1, wo1, wq2, wk2, wv2, wo2, wf1], axis=1).astype(jnp.float32)
    vec_w = max(3 * D, F)

    def _row(v):
        v = jnp.reshape(v, (1, -1)).astype(jnp.float32)
        return jnp.pad(v, ((0, 0), (0, vec_w - v.shape[1])))

    vec_pack = jnp.concatenate([
        _row(jnp.concatenate([jnp.ravel(bq1), jnp.ravel(bk1), jnp.ravel(bv1)])),
        _row(bo1), _row(g1), _row(be1),
        _row(jnp.concatenate([jnp.ravel(bq2), jnp.ravel(bk2), jnp.ravel(bv2)])),
        _row(bo2), _row(g2), _row(be2),
        _row(bf1), _row(bf2), _row(g3), _row(be3)], axis=0)

    x2d = x.reshape(B * S, D)
    enc2d = encoder_output.reshape(B * Se, D)

    n_dec, n_enc = B * S, B * Se
    flops = (2 * n_dec * D * 3 * D + 2 * n_dec * D * D +                     # self QKV + out
             2 * n_dec * D * D + 2 * n_enc * D * 2 * D + 2 * n_dec * D * D +  # cross projections
             2 * n_dec * D * F + 2 * n_dec * F * D +                          # FFN
             n_heads * (4 * n_dec * n_dec * D + 4 * n_dec * n_enc * D))       # attention dots
    transcendentals = n_heads * (n_dec * n_dec + n_dec * n_enc)
    bytes_accessed = 4 * (x2d.size + enc2d.size + w_pack.size + wf2.size +
                          vec_pack.size + 3 * n_dec * D)

    kernel = functools.partial(decoder_block_kernel, B, S, Se, D, F, n_heads)
    packed_out = pl.pallas_call(
        kernel,
        out_shape=jax.ShapeDtypeStruct((3, n_dec, D), jnp.float32),
        compiler_params=pltpu.CompilerParams(vmem_limit_bytes=32 * 1024 * 1024),
        cost_estimate=pl.CostEstimate(flops=flops, transcendentals=transcendentals,
                                      bytes_accessed=bytes_accessed),
    )(x2d, enc2d, w_pack, wf2.astype(jnp.float32), vec_pack)

    packed_out = packed_out.reshape(3, B, S, D)
    return packed_out[0], packed_out[1], packed_out[2]


# ----------------------------- pure-JAX reference for validation ---------------------------

def _mha_ref(q_in, k_in, v_in, wq, bq, wk, bk, wv, bv, wo, bo, mask, n_heads):
    D = q_in.shape[-1]
    hd = D // n_heads
    q = q_in @ wq + bq
    k = k_in @ wk + bk
    v = v_in @ wv + bv
    qh = q.reshape(-1, n_heads, hd)
    kh = k.reshape(-1, n_heads, hd)
    vh = v.reshape(-1, n_heads, hd)
    s = jnp.einsum('qhd,khd->hqk', qh, kh) / math.sqrt(hd)
    if mask is not None:
        s = jnp.where(mask[None] > 0, s, -1e9)
    p = jax.nn.softmax(s, axis=-1)
    o = jnp.einsum('hqk,khd->qhd', p, vh).reshape(-1, D)
    return o @ wo + bo, k, v


def reference(x, enc, tgt_mask, p, n_heads):
    (wq1, bq1, wk1, bk1, wv1, bv1, wo1, bo1, g1, be1,
     wq2, bq2, wk2, bk2, wv2, bv2, wo2, bo2, g2, be2,
     wf1, bf1, wf2, bf2, g3, be3) = p

    def one(xb, encb):
        sa, kp, vp = _mha_ref(xb, xb, xb, wq1, bq1, wk1, bk1, wv1, bv1, wo1, bo1,
                              tgt_mask, n_heads)
        x1 = _layernorm(xb + sa, g1, be1)
        ca, _, _ = _mha_ref(x1, encb, encb, wq2, bq2, wk2, bk2, wv2, bv2, wo2, bo2,
                            None, n_heads)
        x2 = _layernorm(x1 + ca, g2, be2)
        h = jnp.maximum(x2 @ wf1 + bf1, 0.0)
        ff = h @ wf2 + bf2
        return _layernorm(x2 + ff, g3, be3), kp, vp

    return jax.vmap(one)(x, enc)


# ----------------------------- main ---------------------------------------------------------

if __name__ == "__main__":
    B, S, Se = 2, 8, 8
    d_model, n_heads, hidden_ff = 32, 4, 64

    key = jax.random.PRNGKey(0)
    keys = iter(jax.random.split(key, 40))

    def w(shape, scale=0.1):
        return (scale * jax.random.normal(next(keys), shape)).astype(jnp.float32)

    def attn_params():
        return [
            w((d_model, d_model)), w((1, d_model)),   # Wq, bq
            w((d_model, d_model)), w((1, d_model)),   # Wk, bk
            w((d_model, d_model)), w((1, d_model)),   # Wv, bv
            w((d_model, d_model)), w((1, d_model)),   # Wo, bo
        ]

    def ln_params():
        return [jnp.ones((1, d_model), jnp.float32), jnp.zeros((1, d_model), jnp.float32)]

    params = (
        attn_params() + ln_params() +                 # self-attn, norm1
        attn_params() + ln_params() +                 # cross-attn, norm2
        [w((d_model, hidden_ff)), w((1, hidden_ff)),  # FF linear1
         w((hidden_ff, d_model)), w((1, d_model))] +  # FF linear2
        ln_params()                                   # norm3
    )

    x = jax.random.normal(next(keys), (B, S, d_model), dtype=jnp.float32)
    enc = jax.random.normal(next(keys), (B, Se, d_model), dtype=jnp.float32)

    out, new_k, new_v = transformer_decoder_block(x, enc, tuple(params), n_heads)
    jax.block_until_ready((out, new_k, new_v))

    tgt_mask = jnp.tril(jnp.ones((S, S), dtype=jnp.float32))   # causal mask (kernel builds it in-kernel)
    ref_out, ref_k, ref_v = reference(x, enc, tgt_mask, tuple(params), n_heads)
    err = max(float(jnp.max(jnp.abs(out - ref_out))),
              float(jnp.max(jnp.abs(new_k - ref_k))),
              float(jnp.max(jnp.abs(new_v - ref_v))))
    assert err < 1e-2, f"mismatch vs reference: {err}"

    print("KERNEL_OK")
</pallas_src>

<mosaic_0001>
module attributes {stable_mosaic.version = 11 : i64} {
  func.func @decoder_block_kernel(%arg0: memref<16x32xf32, #tpu.memory_space<vmem>>, %arg1: memref<16x32xf32, #tpu.memory_space<vmem>>, %arg2: memref<32x320xf32, #tpu.memory_space<vmem>>, %arg3: memref<64x32xf32, #tpu.memory_space<vmem>>, %arg4: memref<12x96xf32, #tpu.memory_space<vmem>>, %arg5: memref<3x16x32xf32, #tpu.memory_space<vmem>>) attributes {dimension_semantics = [], scalar_prefetch = 0 : i64, scratch_operands = 0 : i64, tpu.core_type = #tpu.core_type<tc>} {
    %c0 = arith.constant 0 : index
    %c0_0 = arith.constant 0 : index
    %0 = vector.load %arg0[%c0, %c0_0] : memref<16x32xf32, #tpu.memory_space<vmem>>, vector<16x32xf32>
    %c0_1 = arith.constant 0 : index
    %c0_2 = arith.constant 0 : index
    %1 = vector.load %arg1[%c0_1, %c0_2] : memref<16x32xf32, #tpu.memory_space<vmem>>, vector<16x32xf32>
    %c0_3 = arith.constant 0 : index
    %c0_4 = arith.constant 0 : index
    %2 = vector.load %arg4[%c0_3, %c0_4] : memref<12x96xf32, #tpu.memory_space<vmem>>, vector<12x96xf32>
    %3 = vector.extract_strided_slice %2 {offsets = [0, 0], sizes = [1, 96], strides = [1, 1]} : vector<12x96xf32> to vector<1x96xf32>
    %4 = vector.extract_strided_slice %2 {offsets = [1, 0], sizes = [1, 32], strides = [1, 1]} : vector<12x96xf32> to vector<1x32xf32>
    %5 = vector.extract_strided_slice %2 {offsets = [2, 0], sizes = [1, 32], strides = [1, 1]} : vector<12x96xf32> to vector<1x32xf32>
    %6 = vector.extract_strided_slice %2 {offsets = [3, 0], sizes = [1, 32], strides = [1, 1]} : vector<12x96xf32> to vector<1x32xf32>
    %7 = vector.extract_strided_slice %2 {offsets = [4, 0], sizes = [1, 96], strides = [1, 1]} : vector<12x96xf32> to vector<1x96xf32>
    %8 = vector.extract_strided_slice %2 {offsets = [5, 0], sizes = [1, 32], strides = [1, 1]} : vector<12x96xf32> to vector<1x32xf32>
    %9 = vector.extract_strided_slice %2 {offsets = [6, 0], sizes = [1, 32], strides = [1, 1]} : vector<12x96xf32> to vector<1x32xf32>
    %10 = vector.extract_strided_slice %2 {offsets = [7, 0], sizes = [1, 32], strides = [1, 1]} : vector<12x96xf32> to vector<1x32xf32>
    %11 = vector.extract_strided_slice %2 {offsets = [8, 0], sizes = [1, 64], strides = [1, 1]} : vector<12x96xf32> to vector<1x64xf32>
    %12 = vector.extract_strided_slice %2 {offsets = [9, 0], sizes = [1, 32], strides = [1, 1]} : vector<12x96xf32> to vector<1x32xf32>
    %13 = vector.extract_strided_slice %2 {offsets = [10, 0], sizes = [1, 32], strides = [1, 1]} : vector<12x96xf32> to vector<1x32xf32>
    %14 = vector.extract_strided_slice %2 {offsets = [11, 0], sizes = [1, 32], strides = [1, 1]} : vector<12x96xf32> to vector<1x32xf32>
    %c0_5 = arith.constant 0 : index
    %c0_6 = arith.constant 0 : index
    %15 = vector.load %arg2[%c0_5, %c0_6] : memref<32x320xf32, #tpu.memory_space<vmem>>, vector<32x96xf32>
    %c0_7 = arith.constant 0 : index
    %c96 = arith.constant 96 : index
    %16 = vector.load %arg2[%c0_7, %c96] : memref<32x320xf32, #tpu.memory_space<vmem>>, vector<32x32xf32>
    %c0_8 = arith.constant 0 : index
    %c128 = arith.constant 128 : index
    %17 = vector.load %arg2[%c0_8, %c128] : memref<32x320xf32, #tpu.memory_space<vmem>>, vector<32x32xf32>
    %c0_9 = arith.constant 0 : index
    %c160 = arith.constant 160 : index
    %18 = vector.load %arg2[%c0_9, %c160] : memref<32x320xf32, #tpu.memory_space<vmem>>, vector<32x64xf32>
    %c0_10 = arith.constant 0 : index
    %c224 = arith.constant 224 : index
    %19 = vector.load %arg2[%c0_10, %c224] : memref<32x320xf32, #tpu.memory_space<vmem>>, vector<32x32xf32>
    %c0_11 = arith.constant 0 : index
    %c256 = arith.constant 256 : index
    %20 = vector.load %arg2[%c0_11, %c256] : memref<32x320xf32, #tpu.memory_space<vmem>>, vector<32x64xf32>
    %c0_12 = arith.constant 0 : index
    %c0_13 = arith.constant 0 : index
    %21 = vector.load %arg3[%c0_12, %c0_13] : memref<64x32xf32, #tpu.memory_space<vmem>>, vector<64x32xf32>
    %22 = tpu.iota {dimensions = array<i32: 0>} : vector<16x16xi32>
    %23 = arith.sitofp %22 : vector<16x16xi32> to vector<16x16xf32>
    %24 = tpu.iota {dimensions = array<i32: 1>} : vector<16x16xi32>
    %25 = arith.sitofp %24 : vector<16x16xi32> to vector<16x16xf32>
    %cst = arith.constant 5.000000e-01 : f32
    %26 = vector.broadcast %cst : f32 to vector<16x16xf32>
    %27 = arith.addf %23, %26 : vector<16x16xf32>
    %cst_14 = arith.constant 1.250000e-01 : f32
    %28 = vector.broadcast %cst_14 : f32 to vector<16x16xf32>
    %29 = arith.mulf %27, %28 : vector<16x16xf32>
    %30 = math.floor %29 : vector<16x16xf32>
    %cst_15 = arith.constant 5.000000e-01 : f32
    %31 = vector.broadcast %cst_15 : f32 to vector<16x16xf32>
    %32 = arith.addf %25, %31 : vector<16x16xf32>
    %cst_16 = arith.constant 1.250000e-01 : f32
    %33 = vector.broadcast %cst_16 : f32 to vector<16x16xf32>
    %34 = arith.mulf %32, %33 : vector<16x16xf32>
    %35 = math.floor %34 : vector<16x16xf32>
    %36 = arith.cmpf oeq, %30, %35 : vector<16x16xf32>
    %cst_17 = arith.constant 8.000000e+00 : f32
    %37 = vector.broadcast %cst_17 : f32 to vector<16x16xf32>
    %38 = arith.mulf %35, %37 : vector<16x16xf32>
    %39 = arith.subf %25, %38 : vector<16x16xf32>
    %cst_18 = arith.constant 8.000000e+00 : f32
    %40 = vector.broadcast %cst_18 : f32 to vector<16x16xf32>
    %41 = arith.mulf %30, %40 : vector<16x16xf32>
    %42 = arith.subf %23, %41 : vector<16x16xf32>
    %43 = arith.cmpf ole, %39, %42 : vector<16x16xf32>
    %44 = arith.andi %36, %43 : vector<16x16xi1>
    %cst_19 = arith.constant 0.000000e+00 : f32
    %cst_20 = arith.constant -1.000000e+09 : f32
    %45 = vector.broadcast %cst_19 : f32 to vector<16x16xf32>
    %46 = vector.broadcast %cst_20 : f32 to vector<16x16xf32>
    %47 = arith.select %44, %45, %46 : vector<16x16xi1>, vector<16x16xf32>
    %48 = tpu.iota {dimensions = array<i32: 0>} : vector<16x16xi32>
    %49 = arith.sitofp %48 : vector<16x16xi32> to vector<16x16xf32>
    %50 = tpu.iota {dimensions = array<i32: 1>} : vector<16x16xi32>
    %51 = arith.sitofp %50 : vector<16x16xi32> to vector<16x16xf32>
    %cst_21 = arith.constant 5.000000e-01 : f32
    %52 = vector.broadcast %cst_21 : f32 to vector<16x16xf32>
    %53 = arith.addf %49, %52 : vector<16x16xf32>
    %cst_22 = arith.constant 1.250000e-01 : f32
    %54 = vector.broadcast %cst_22 : f32 to vector<16x16xf32>
    %55 = arith.mulf %53, %54 : vector<16x16xf32>
    %56 = math.floor %55 : vector<16x16xf32>
    %cst_23 = arith.constant 5.000000e-01 : f32
    %57 = vector.broadcast %cst_23 : f32 to vector<16x16xf32>
    %58 = arith.addf %51, %57 : vector<16x16xf32>
    %cst_24 = arith.constant 1.250000e-01 : f32
    %59 = vector.broadcast %cst_24 : f32 to vector<16x16xf32>
    %60 = arith.mulf %58, %59 : vector<16x16xf32>
    %61 = math.floor %60 : vector<16x16xf32>
    %62 = arith.cmpf oeq, %56, %61 : vector<16x16xf32>
    %cst_25 = arith.constant 0.000000e+00 : f32
    %cst_26 = arith.constant -1.000000e+09 : f32
    %63 = vector.broadcast %cst_25 : f32 to vector<16x16xf32>
    %64 = vector.broadcast %cst_26 : f32 to vector<16x16xf32>
    %65 = arith.select %62, %63, %64 : vector<16x16xi1>, vector<16x16xf32>
    %cst_27 = arith.constant dense<0.000000e+00> : vector<16x96xf32>
    %66 = tpu.matmul %0, %15, %cst_27 {dimension_numbers = #tpu.dot_dimension_numbers<[1], [0], [0], [1], [0, 0, 1, 1], [], []>} : vector<16x32xf32>, vector<32x96xf32>, vector<16x96xf32> -> vector<16x96xf32>
    %67 = vector.broadcast %3 : vector<1x96xf32> to vector<16x96xf32>
    %68 = arith.addf %66, %67 : vector<16x96xf32>
    %69 = vector.extract_strided_slice %68 {offsets = [0, 0], sizes = [16, 32], strides = [1, 1]} : vector<16x96xf32> to vector<16x32xf32>
    %70 = vector.extract_strided_slice %68 {offsets = [0, 32], sizes = [16, 32], strides = [1, 1]} : vector<16x96xf32> to vector<16x32xf32>
    %71 = vector.extract_strided_slice %68 {offsets = [0, 64], sizes = [16, 32], strides = [1, 1]} : vector<16x96xf32> to vector<16x32xf32>
    %72 = tpu.transpose %70, [1, 0] : vector<16x32xf32> -> vector<32x16xf32>
    %73 = tpu.iota {dimensions = array<i32: 1>} : vector<1x32xi32>
    %cst_28 = arith.constant 0.000000e+00 : f32
    %74 = vector.broadcast %cst_28 : f32 to vector<16x32xf32>
    %c0_i32 = arith.constant 0 : i32
    %75 = vector.broadcast %c0_i32 : i32 to vector<1x32xi32>
    %76 = arith.cmpi sge, %73, %75 : vector<1x32xi32>
    %c8_i32 = arith.constant 8 : i32
    %77 = vector.broadcast %c8_i32 : i32 to vector<1x32xi32>
    %78 = arith.cmpi slt, %73, %77 : vector<1x32xi32>
    %79 = arith.andi %76, %78 : vector<1x32xi1>
    %80 = arith.extui %79 : vector<1x32xi1> to vector<1x32xi32>
    %81 = arith.sitofp %80 : vector<1x32xi32> to vector<1x32xf32>
    %82 = vector.broadcast %81 : vector<1x32xf32> to vector<16x32xf32>
    %83 = arith.mulf %69, %82 : vector<16x32xf32>
    %cst_29 = arith.constant dense<0.000000e+00> : vector<16x16xf32>
    %84 = tpu.matmul %83, %72, %cst_29 {dimension_numbers = #tpu.dot_dimension_numbers<[1], [0], [0], [1], [0, 0, 1, 1], [], []>} : vector<16x32xf32>, vector<32x16xf32>, vector<16x16xf32> -> vector<16x16xf32>
    %cst_30 = arith.constant 0.353553385 : f32
    %85 = vector.broadcast %cst_30 : f32 to vector<16x16xf32>
    %86 = arith.mulf %84, %85 : vector<16x16xf32>
    %87 = arith.addf %86, %47 : vector<16x16xf32>
    %cst_31 = arith.constant dense<0xFF800000> : vector<16xf32>
    %88 = vector.multi_reduction <maximumf>, %87, %cst_31 [1] : vector<16x16xf32> to vector<16xf32>
    %89 = vector.shape_cast %88 : vector<16xf32> to vector<16x1xf32>
    %90 = vector.broadcast %89 : vector<16x1xf32> to vector<16x16xf32>
    %91 = arith.subf %87, %90 : vector<16x16xf32>
    %92 = math.exp %91 : vector<16x16xf32>
    %cst_32 = arith.constant dense<0.000000e+00> : vector<16xf32>
    %93 = vector.multi_reduction <add>, %92, %cst_32 [1] : vector<16x16xf32> to vector<16xf32>
    %94 = vector.shape_cast %93 : vector<16xf32> to vector<16x1xf32>
    %95 = tpu.reciprocal %94 {approx = true} : vector<16x1xf32> -> vector<16x1xf32>
    %96 = vector.broadcast %95 : vector<16x1xf32> to vector<16x16xf32>
    %97 = arith.mulf %92, %96 : vector<16x16xf32>
    %98 = vector.broadcast %81 : vector<1x32xf32> to vector<16x32xf32>
    %99 = arith.mulf %71, %98 : vector<16x32xf32>
    %cst_33 = arith.constant dense<0.000000e+00> : vector<16x32xf32>
    %100 = tpu.matmul %97, %99, %cst_33 {dimension_numbers = #tpu.dot_dimension_numbers<[1], [0], [0], [1], [0, 0, 1, 1], [], []>} : vector<16x16xf32>, vector<16x32xf32>, vector<16x32xf32> -> vector<16x32xf32>
    %101 = arith.addf %74, %100 : vector<16x32xf32>
    %c8_i32_34 = arith.constant 8 : i32
    %102 = vector.broadcast %c8_i32_34 : i32 to vector<1x32xi32>
    %103 = arith.cmpi sge, %73, %102 : vector<1x32xi32>
    %c16_i32 = arith.constant 16 : i32
    %104 = vector.broadcast %c16_i32 : i32 to vector<1x32xi32>
    %105 = arith.cmpi slt, %73, %104 : vector<1x32xi32>
    %106 = arith.andi %103, %105 : vector<1x32xi1>
    %107 = arith.extui %106 : vector<1x32xi1> to vector<1x32xi32>
    %108 = arith.sitofp %107 : vector<1x32xi32> to vector<1x32xf32>
    %109 = vector.broadcast %108 : vector<1x32xf32> to vector<16x32xf32>
    %110 = arith.mulf %69, %109 : vector<16x32xf32>
    %cst_35 = arith.constant dense<0.000000e+00> : vector<16x16xf32>
    %111 = tpu.matmul %110, %72, %cst_35 {dimension_numbers = #tpu.dot_dimension_numbers<[1], [0], [0], [1], [0, 0, 1, 1], [], []>} : vector<16x32xf32>, vector<32x16xf32>, vector<16x16xf32> -> vector<16x16xf32>
    %cst_36 = arith.constant 0.353553385 : f32
    %112 = vector.broadcast %cst_36 : f32 to vector<16x16xf32>
    %113 = arith.mulf %111, %112 : vector<16x16xf32>
    %114 = arith.addf %113, %47 : vector<16x16xf32>
    %cst_37 = arith.constant dense<0xFF800000> : vector<16xf32>
    %115 = vector.multi_reduction <maximumf>, %114, %cst_37 [1] : vector<16x16xf32> to vector<16xf32>
    %116 = vector.shape_cast %115 : vector<16xf32> to vector<16x1xf32>
    %117 = vector.broadcast %116 : vector<16x1xf32> to vector<16x16xf32>
    %118 = arith.subf %114, %117 : vector<16x16xf32>
    %119 = math.exp %118 : vector<16x16xf32>
    %cst_38 = arith.constant dense<0.000000e+00> : vector<16xf32>
    %120 = vector.multi_reduction <add>, %119, %cst_38 [1] : vector<16x16xf32> to vector<16xf32>
    %121 = vector.shape_cast %120 : vector<16xf32> to vector<16x1xf32>
    %122 = tpu.reciprocal %121 {approx = true} : vector<16x1xf32> -> vector<16x1xf32>
    %123 = vector.broadcast %122 : vector<16x1xf32> to vector<16x16xf32>
    %124 = arith.mulf %119, %123 : vector<16x16xf32>
    %125 = vector.broadcast %108 : vector<1x32xf32> to vector<16x32xf32>
    %126 = arith.mulf %71, %125 : vector<16x32xf32>
    %cst_39 = arith.constant dense<0.000000e+00> : vector<16x32xf32>
    %127 = tpu.matmul %124, %126, %cst_39 {dimension_numbers = #tpu.dot_dimension_numbers<[1], [0], [0], [1], [0, 0, 1, 1], [], []>} : vector<16x16xf32>, vector<16x32xf32>, vector<16x32xf32> -> vector<16x32xf32>
    %128 = arith.addf %101, %127 : vector<16x32xf32>
    %c16_i32_40 = arith.constant 16 : i32
    %129 = vector.broadcast %c16_i32_40 : i32 to vector<1x32xi32>
    %130 = arith.cmpi sge, %73, %129 : vector<1x32xi32>
    %c24_i32 = arith.constant 24 : i32
    %131 = vector.broadcast %c24_i32 : i32 to vector<1x32xi32>
    %132 = arith.cmpi slt, %73, %131 : vector<1x32xi32>
    %133 = arith.andi %130, %132 : vector<1x32xi1>
    %134 = arith.extui %133 : vector<1x32xi1> to vector<1x32xi32>
    %135 = arith.sitofp %134 : vector<1x32xi32> to vector<1x32xf32>
    %136 = vector.broadcast %135 : vector<1x32xf32> to vector<16x32xf32>
    %137 = arith.mulf %69, %136 : vector<16x32xf32>
    %cst_41 = arith.constant dense<0.000000e+00> : vector<16x16xf32>
    %138 = tpu.matmul %137, %72, %cst_41 {dimension_numbers = #tpu.dot_dimension_numbers<[1], [0], [0], [1], [0, 0, 1, 1], [], []>} : vector<16x32xf32>, vector<32x16xf32>, vector<16x16xf32> -> vector<16x16xf32>
    %cst_42 = arith.constant 0.353553385 : f32
    %139 = vector.broadcast %cst_42 : f32 to vector<16x16xf32>
    %140 = arith.mulf %138, %139 : vector<16x16xf32>
    %141 = arith.addf %140, %47 : vector<16x16xf32>
    %cst_43 = arith.constant dense<0xFF800000> : vector<16xf32>
    %142 = vector.multi_reduction <maximumf>, %141, %cst_43 [1] : vector<16x16xf32> to vector<16xf32>
    %143 = vector.shape_cast %142 : vector<16xf32> to vector<16x1xf32>
    %144 = vector.broadcast %143 : vector<16x1xf32> to vector<16x16xf32>
    %145 = arith.subf %141, %144 : vector<16x16xf32>
    %146 = math.exp %145 : vector<16x16xf32>
    %cst_44 = arith.constant dense<0.000000e+00> : vector<16xf32>
    %147 = vector.multi_reduction <add>, %146, %cst_44 [1] : vector<16x16xf32> to vector<16xf32>
    %148 = vector.shape_cast %147 : vector<16xf32> to vector<16x1xf32>
    %149 = tpu.reciprocal %148 {approx = true} : vector<16x1xf32> -> vector<16x1xf32>
    %150 = vector.broadcast %149 : vector<16x1xf32> to vector<16x16xf32>
    %151 = arith.mulf %146, %150 : vector<16x16xf32>
    %152 = vector.broadcast %135 : vector<1x32xf32> to vector<16x32xf32>
    %153 = arith.mulf %71, %152 : vector<16x32xf32>
    %cst_45 = arith.constant dense<0.000000e+00> : vector<16x32xf32>
    %154 = tpu.matmul %151, %153, %cst_45 {dimension_numbers = #tpu.dot_dimension_numbers<[1], [0], [0], [1], [0, 0, 1, 1], [], []>} : vector<16x16xf32>, vector<16x32xf32>, vector<16x32xf32> -> vector<16x32xf32>
    %155 = arith.addf %128, %154 : vector<16x32xf32>
    %c24_i32_46 = arith.constant 24 : i32
    %156 = vector.broadcast %c24_i32_46 : i32 to vector<1x32xi32>
    %157 = arith.cmpi sge, %73, %156 : vector<1x32xi32>
    %c32_i32 = arith.constant 32 : i32
    %158 = vector.broadcast %c32_i32 : i32 to vector<1x32xi32>
    %159 = arith.cmpi slt, %73, %158 : vector<1x32xi32>
    %160 = arith.andi %157, %159 : vector<1x32xi1>
    %161 = arith.extui %160 : vector<1x32xi1> to vector<1x32xi32>
    %162 = arith.sitofp %161 : vector<1x32xi32> to vector<1x32xf32>
    %163 = vector.broadcast %162 : vector<1x32xf32> to vector<16x32xf32>
    %164 = arith.mulf %69, %163 : vector<16x32xf32>
    %cst_47 = arith.constant dense<0.000000e+00> : vector<16x16xf32>
    %165 = tpu.matmul %164, %72, %cst_47 {dimension_numbers = #tpu.dot_dimension_numbers<[1], [0], [0], [1], [0, 0, 1, 1], [], []>} : vector<16x32xf32>, vector<32x16xf32>, vector<16x16xf32> -> vector<16x16xf32>
    %cst_48 = arith.constant 0.353553385 : f32
    %166 = vector.broadcast %cst_48 : f32 to vector<16x16xf32>
    %167 = arith.mulf %165, %166 : vector<16x16xf32>
    %168 = arith.addf %167, %47 : vector<16x16xf32>
    %cst_49 = arith.constant dense<0xFF800000> : vector<16xf32>
    %169 = vector.multi_reduction <maximumf>, %168, %cst_49 [1] : vector<16x16xf32> to vector<16xf32>
    %170 = vector.shape_cast %169 : vector<16xf32> to vector<16x1xf32>
    %171 = vector.broadcast %170 : vector<16x1xf32> to vector<16x16xf32>
    %172 = arith.subf %168, %171 : vector<16x16xf32>
    %173 = math.exp %172 : vector<16x16xf32>
    %cst_50 = arith.constant dense<0.000000e+00> : vector<16xf32>
    %174 = vector.multi_reduction <add>, %173, %cst_50 [1] : vector<16x16xf32> to vector<16xf32>
    %175 = vector.shape_cast %174 : vector<16xf32> to vector<16x1xf32>
    %176 = tpu.reciprocal %175 {approx = true} : vector<16x1xf32> -> vector<16x1xf32>
    %177 = vector.broadcast %176 : vector<16x1xf32> to vector<16x16xf32>
    %178 = arith.mulf %173, %177 : vector<16x16xf32>
    %179 = vector.broadcast %162 : vector<1x32xf32> to vector<16x32xf32>
    %180 = arith.mulf %71, %179 : vector<16x32xf32>
    %cst_51 = arith.constant dense<0.000000e+00> : vector<16x32xf32>
    %181 = tpu.matmul %178, %180, %cst_51 {dimension_numbers = #tpu.dot_dimension_numbers<[1], [0], [0], [1], [0, 0, 1, 1], [], []>} : vector<16x16xf32>, vector<16x32xf32>, vector<16x32xf32> -> vector<16x32xf32>
    %182 = arith.addf %155, %181 : vector<16x32xf32>
    %cst_52 = arith.constant dense<0.000000e+00> : vector<16x32xf32>
    %183 = tpu.matmul %182, %16, %cst_52 {dimension_numbers = #tpu.dot_dimension_numbers<[1], [0], [0], [1], [0, 0, 1, 1], [], []>} : vector<16x32xf32>, vector<32x32xf32>, vector<16x32xf32> -> vector<16x32xf32>
    %184 = vector.broadcast %4 : vector<1x32xf32> to vector<16x32xf32>
    %185 = arith.addf %183, %184 : vector<16x32xf32>
    %186 = arith.addf %0, %185 : vector<16x32xf32>
    %cst_53 = arith.constant dense<0.000000e+00> : vector<16xf32>
    %187 = vector.multi_reduction <add>, %186, %cst_53 [1] : vector<16x32xf32> to vector<16xf32>
    %188 = vector.shape_cast %187 : vector<16xf32> to vector<16x1xf32>
    %cst_54 = arith.constant 3.200000e+01 : f32
    %189 = vector.broadcast %cst_54 : f32 to vector<16x1xf32>
    %190 = arith.divf %188, %189 : vector<16x1xf32>
    %191 = vector.broadcast %190 : vector<16x1xf32> to vector<16x32xf32>
    %192 = arith.subf %186, %191 : vector<16x32xf32>
    %193 = arith.mulf %192, %192 : vector<16x32xf32>
    %cst_55 = arith.constant dense<0.000000e+00> : vector<16xf32>
    %194 = vector.multi_reduction <add>, %193, %cst_55 [1] : vector<16x32xf32> to vector<16xf32>
    %195 = vector.shape_cast %194 : vector<16xf32> to vector<16x1xf32>
    %cst_56 = arith.constant 3.200000e+01 : f32
    %196 = vector.broadcast %cst_56 : f32 to vector<16x1xf32>
    %197 = arith.divf %195, %196 : vector<16x1xf32>
    %198 = vector.broadcast %190 : vector<16x1xf32> to vector<16x32xf32>
    %199 = arith.subf %186, %198 : vector<16x32xf32>
    %cst_57 = arith.constant 9.99999974E-6 : f32
    %200 = vector.broadcast %cst_57 : f32 to vector<16x1xf32>
    %201 = arith.addf %197, %200 : vector<16x1xf32>
    %202 = math.rsqrt %201 : vector<16x1xf32>
    %203 = vector.broadcast %202 : vector<16x1xf32> to vector<16x32xf32>
    %204 = arith.mulf %199, %203 : vector<16x32xf32>
    %205 = vector.broadcast %5 : vector<1x32xf32> to vector<16x32xf32>
    %206 = arith.mulf %204, %205 : vector<16x32xf32>
    %207 = vector.broadcast %6 : vector<1x32xf32> to vector<16x32xf32>
    %208 = arith.addf %206, %207 : vector<16x32xf32>
    %cst_58 = arith.constant dense<0.000000e+00> : vector<16x32xf32>
    %209 = tpu.matmul %208, %17, %cst_58 {dimension_numbers = #tpu.dot_dimension_numbers<[1], [0], [0], [1], [0, 0, 1, 1], [], []>} : vector<16x32xf32>, vector<32x32xf32>, vector<16x32xf32> -> vector<16x32xf32>
    %210 = vector.extract_strided_slice %7 {offsets = [0, 0], sizes = [1, 32], strides = [1, 1]} : vector<1x96xf32> to vector<1x32xf32>
    %211 = vector.broadcast %210 : vector<1x32xf32> to vector<16x32xf32>
    %212 = arith.addf %209, %211 : vector<16x32xf32>
    %cst_59 = arith.constant dense<0.000000e+00> : vector<16x64xf32>
    %213 = tpu.matmul %1, %18, %cst_59 {dimension_numbers = #tpu.dot_dimension_numbers<[1], [0], [0], [1], [0, 0, 1, 1], [], []>} : vector<16x32xf32>, vector<32x64xf32>, vector<16x64xf32> -> vector<16x64xf32>
    %214 = vector.extract_strided_slice %7 {offsets = [0, 32], sizes = [1, 64], strides = [1, 1]} : vector<1x96xf32> to vector<1x64xf32>
    %215 = vector.broadcast %214 : vector<1x64xf32> to vector<16x64xf32>
    %216 = arith.addf %213, %215 : vector<16x64xf32>
    %217 = vector.extract_strided_slice %216 {offsets = [0, 0], sizes = [16, 32], strides = [1, 1]} : vector<16x64xf32> to vector<16x32xf32>
    %218 = vector.extract_strided_slice %216 {offsets = [0, 32], sizes = [16, 32], strides = [1, 1]} : vector<16x64xf32> to vector<16x32xf32>
    %219 = tpu.transpose %217, [1, 0] : vector<16x32xf32> -> vector<32x16xf32>
    %220 = tpu.iota {dimensions = array<i32: 1>} : vector<1x32xi32>
    %cst_60 = arith.constant 0.000000e+00 : f32
    %221 = vector.broadcast %cst_60 : f32 to vector<16x32xf32>
    %c0_i32_61 = arith.constant 0 : i32
    %222 = vector.broadcast %c0_i32_61 : i32 to vector<1x32xi32>
    %223 = arith.cmpi sge, %220, %222 : vector<1x32xi32>
    %c8_i32_62 = arith.constant 8 : i32
    %224 = vector.broadcast %c8_i32_62 : i32 to vector<1x32xi32>
    %225 = arith.cmpi slt, %220, %224 : vector<1x32xi32>
    %226 = arith.andi %223, %225 : vector<1x32xi1>
    %227 = arith.extui %226 : vector<1x32xi1> to vector<1x32xi32>
    %228 = arith.sitofp %227 : vector<1x32xi32> to vector<1x32xf32>
    %229 = vector.broadcast %228 : vector<1x32xf32> to vector<16x32xf32>
    %230 = arith.mulf %212, %229 : vector<16x32xf32>
    %cst_63 = arith.constant dense<0.000000e+00> : vector<16x16xf32>
    %231 = tpu.matmul %230, %219, %cst_63 {dimension_numbers = #tpu.dot_dimension_numbers<[1], [0], [0], [1], [0, 0, 1, 1], [], []>} : vector<16x32xf32>, vector<32x16xf32>, vector<16x16xf32> -> vector<16x16xf32>
    %cst_64 = arith.constant 0.353553385 : f32
    %232 = vector.broadcast %cst_64 : f32 to vector<16x16xf32>
    %233 = arith.mulf %231, %232 : vector<16x16xf32>
    %234 = arith.addf %233, %65 : vector<16x16xf32>
    %cst_65 = arith.constant dense<0xFF800000> : vector<16xf32>
    %235 = vector.multi_reduction <maximumf>, %234, %cst_65 [1] : vector<16x16xf32> to vector<16xf32>
    %236 = vector.shape_cast %235 : vector<16xf32> to vector<16x1xf32>
    %237 = vector.broadcast %236 : vector<16x1xf32> to vector<16x16xf32>
    %238 = arith.subf %234, %237 : vector<16x16xf32>
    %239 = math.exp %238 : vector<16x16xf32>
    %cst_66 = arith.constant dense<0.000000e+00> : vector<16xf32>
    %240 = vector.multi_reduction <add>, %239, %cst_66 [1] : vector<16x16xf32> to vector<16xf32>
    %241 = vector.shape_cast %240 : vector<16xf32> to vector<16x1xf32>
    %242 = tpu.reciprocal %241 {approx = true} : vector<16x1xf32> -> vector<16x1xf32>
    %243 = vector.broadcast %242 : vector<16x1xf32> to vector<16x16xf32>
    %244 = arith.mulf %239, %243 : vector<16x16xf32>
    %245 = vector.broadcast %228 : vector<1x32xf32> to vector<16x32xf32>
    %246 = arith.mulf %218, %245 : vector<16x32xf32>
    %cst_67 = arith.constant dense<0.000000e+00> : vector<16x32xf32>
    %247 = tpu.matmul %244, %246, %cst_67 {dimension_numbers = #tpu.dot_dimension_numbers<[1], [0], [0], [1], [0, 0, 1, 1], [], []>} : vector<16x16xf32>, vector<16x32xf32>, vector<16x32xf32> -> vector<16x32xf32>
    %248 = arith.addf %221, %247 : vector<16x32xf32>
    %c8_i32_68 = arith.constant 8 : i32
    %249 = vector.broadcast %c8_i32_68 : i32 to vector<1x32xi32>
    %250 = arith.cmpi sge, %220, %249 : vector<1x32xi32>
    %c16_i32_69 = arith.constant 16 : i32
    %251 = vector.broadcast %c16_i32_69 : i32 to vector<1x32xi32>
    %252 = arith.cmpi slt, %220, %251 : vector<1x32xi32>
    %253 = arith.andi %250, %252 : vector<1x32xi1>
    %254 = arith.extui %253 : vector<1x32xi1> to vector<1x32xi32>
    %255 = arith.sitofp %254 : vector<1x32xi32> to vector<1x32xf32>
    %256 = vector.broadcast %255 : vector<1x32xf32> to vector<16x32xf32>
    %257 = arith.mulf %212, %256 : vector<16x32xf32>
    %cst_70 = arith.constant dense<0.000000e+00> : vector<16x16xf32>
    %258 = tpu.matmul %257, %219, %cst_70 {dimension_numbers = #tpu.dot_dimension_numbers<[1], [0], [0], [1], [0, 0, 1, 1], [], []>} : vector<16x32xf32>, vector<32x16xf32>, vector<16x16xf32> -> vector<16x16xf32>
    %cst_71 = arith.constant 0.353553385 : f32
    %259 = vector.broadcast %cst_71 : f32 to vector<16x16xf32>
    %260 = arith.mulf %258, %259 : vector<16x16xf32>
    %261 = arith.addf %260, %65 : vector<16x16xf32>
    %cst_72 = arith.constant dense<0xFF800000> : vector<16xf32>
    %262 = vector.multi_reduction <maximumf>, %261, %cst_72 [1] : vector<16x16xf32> to vector<16xf32>
    %263 = vector.shape_cast %262 : vector<16xf32> to vector<16x1xf32>
    %264 = vector.broadcast %263 : vector<16x1xf32> to vector<16x16xf32>
    %265 = arith.subf %261, %264 : vector<16x16xf32>
    %266 = math.exp %265 : vector<16x16xf32>
    %cst_73 = arith.constant dense<0.000000e+00> : vector<16xf32>
    %267 = vector.multi_reduction <add>, %266, %cst_73 [1] : vector<16x16xf32> to vector<16xf32>
    %268 = vector.shape_cast %267 : vector<16xf32> to vector<16x1xf32>
    %269 = tpu.reciprocal %268 {approx = true} : vector<16x1xf32> -> vector<16x1xf32>
    %270 = vector.broadcast %269 : vector<16x1xf32> to vector<16x16xf32>
    %271 = arith.mulf %266, %270 : vector<16x16xf32>
    %272 = vector.broadcast %255 : vector<1x32xf32> to vector<16x32xf32>
    %273 = arith.mulf %218, %272 : vector<16x32xf32>
    %cst_74 = arith.constant dense<0.000000e+00> : vector<16x32xf32>
    %274 = tpu.matmul %271, %273, %cst_74 {dimension_numbers = #tpu.dot_dimension_numbers<[1], [0], [0], [1], [0, 0, 1, 1], [], []>} : vector<16x16xf32>, vector<16x32xf32>, vector<16x32xf32> -> vector<16x32xf32>
    %275 = arith.addf %248, %274 : vector<16x32xf32>
    %c16_i32_75 = arith.constant 16 : i32
    %276 = vector.broadcast %c16_i32_75 : i32 to vector<1x32xi32>
    %277 = arith.cmpi sge, %220, %276 : vector<1x32xi32>
    %c24_i32_76 = arith.constant 24 : i32
    %278 = vector.broadcast %c24_i32_76 : i32 to vector<1x32xi32>
    %279 = arith.cmpi slt, %220, %278 : vector<1x32xi32>
    %280 = arith.andi %277, %279 : vector<1x32xi1>
    %281 = arith.extui %280 : vector<1x32xi1> to vector<1x32xi32>
    %282 = arith.sitofp %281 : vector<1x32xi32> to vector<1x32xf32>
    %283 = vector.broadcast %282 : vector<1x32xf32> to vector<16x32xf32>
    %284 = arith.mulf %212, %283 : vector<16x32xf32>
    %cst_77 = arith.constant dense<0.000000e+00> : vector<16x16xf32>
    %285 = tpu.matmul %284, %219, %cst_77 {dimension_numbers = #tpu.dot_dimension_numbers<[1], [0], [0], [1], [0, 0, 1, 1], [], []>} : vector<16x32xf32>, vector<32x16xf32>, vector<16x16xf32> -> vector<16x16xf32>
    %cst_78 = arith.constant 0.353553385 : f32
    %286 = vector.broadcast %cst_78 : f32 to vector<16x16xf32>
    %287 = arith.mulf %285, %286 : vector<16x16xf32>
    %288 = arith.addf %287, %65 : vector<16x16xf32>
    %cst_79 = arith.constant dense<0xFF800000> : vector<16xf32>
    %289 = vector.multi_reduction <maximumf>, %288, %cst_79 [1] : vector<16x16xf32> to vector<16xf32>
    %290 = vector.shape_cast %289 : vector<16xf32> to vector<16x1xf32>
    %291 = vector.broadcast %290 : vector<16x1xf32> to vector<16x16xf32>
    %292 = arith.subf %288, %291 : vector<16x16xf32>
    %293 = math.exp %292 : vector<16x16xf32>
    %cst_80 = arith.constant dense<0.000000e+00> : vector<16xf32>
    %294 = vector.multi_reduction <add>, %293, %cst_80 [1] : vector<16x16xf32> to vector<16xf32>
    %295 = vector.shape_cast %294 : vector<16xf32> to vector<16x1xf32>
    %296 = tpu.reciprocal %295 {approx = true} : vector<16x1xf32> -> vector<16x1xf32>
    %297 = vector.broadcast %296 : vector<16x1xf32> to vector<16x16xf32>
    %298 = arith.mulf %293, %297 : vector<16x16xf32>
    %299 = vector.broadcast %282 : vector<1x32xf32> to vector<16x32xf32>
    %300 = arith.mulf %218, %299 : vector<16x32xf32>
    %cst_81 = arith.constant dense<0.000000e+00> : vector<16x32xf32>
    %301 = tpu.matmul %298, %300, %cst_81 {dimension_numbers = #tpu.dot_dimension_numbers<[1], [0], [0], [1], [0, 0, 1, 1], [], []>} : vector<16x16xf32>, vector<16x32xf32>, vector<16x32xf32> -> vector<16x32xf32>
    %302 = arith.addf %275, %301 : vector<16x32xf32>
    %c24_i32_82 = arith.constant 24 : i32
    %303 = vector.broadcast %c24_i32_82 : i32 to vector<1x32xi32>
    %304 = arith.cmpi sge, %220, %303 : vector<1x32xi32>
    %c32_i32_83 = arith.constant 32 : i32
    %305 = vector.broadcast %c32_i32_83 : i32 to vector<1x32xi32>
    %306 = arith.cmpi slt, %220, %305 : vector<1x32xi32>
    %307 = arith.andi %304, %306 : vector<1x32xi1>
    %308 = arith.extui %307 : vector<1x32xi1> to vector<1x32xi32>
    %309 = arith.sitofp %308 : vector<1x32xi32> to vector<1x32xf32>
    %310 = vector.broadcast %309 : vector<1x32xf32> to vector<16x32xf32>
    %311 = arith.mulf %212, %310 : vector<16x32xf32>
    %cst_84 = arith.constant dense<0.000000e+00> : vector<16x16xf32>
    %312 = tpu.matmul %311, %219, %cst_84 {dimension_numbers = #tpu.dot_dimension_numbers<[1], [0], [0], [1], [0, 0, 1, 1], [], []>} : vector<16x32xf32>, vector<32x16xf32>, vector<16x16xf32> -> vector<16x16xf32>
    %cst_85 = arith.constant 0.353553385 : f32
    %313 = vector.broadcast %cst_85 : f32 to vector<16x16xf32>
    %314 = arith.mulf %312, %313 : vector<16x16xf32>
    %315 = arith.addf %314, %65 : vector<16x16xf32>
    %cst_86 = arith.constant dense<0xFF800000> : vector<16xf32>
    %316 = vector.multi_reduction <maximumf>, %315, %cst_86 [1] : vector<16x16xf32> to vector<16xf32>
    %317 = vector.shape_cast %316 : vector<16xf32> to vector<16x1xf32>
    %318 = vector.broadcast %317 : vector<16x1xf32> to vector<16x16xf32>
    %319 = arith.subf %315, %318 : vector<16x16xf32>
    %320 = math.exp %319 : vector<16x16xf32>
    %cst_87 = arith.constant dense<0.000000e+00> : vector<16xf32>
    %321 = vector.multi_reduction <add>, %320, %cst_87 [1] : vector<16x16xf32> to vector<16xf32>
    %322 = vector.shape_cast %321 : vector<16xf32> to vector<16x1xf32>
    %323 = tpu.reciprocal %322 {approx = true} : vector<16x1xf32> -> vector<16x1xf32>
    %324 = vector.broadcast %323 : vector<16x1xf32> to vector<16x16xf32>
    %325 = arith.mulf %320, %324 : vector<16x16xf32>
    %326 = vector.broadcast %309 : vector<1x32xf32> to vector<16x32xf32>
    %327 = arith.mulf %218, %326 : vector<16x32xf32>
    %cst_88 = arith.constant dense<0.000000e+00> : vector<16x32xf32>
    %328 = tpu.matmul %325, %327, %cst_88 {dimension_numbers = #tpu.dot_dimension_numbers<[1], [0], [0], [1], [0, 0, 1, 1], [], []>} : vector<16x16xf32>, vector<16x32xf32>, vector<16x32xf32> -> vector<16x32xf32>
    %329 = arith.addf %302, %328 : vector<16x32xf32>
    %cst_89 = arith.constant dense<0.000000e+00> : vector<16x32xf32>
    %330 = tpu.matmul %329, %19, %cst_89 {dimension_numbers = #tpu.dot_dimension_numbers<[1], [0], [0], [1], [0, 0, 1, 1], [], []>} : vector<16x32xf32>, vector<32x32xf32>, vector<16x32xf32> -> vector<16x32xf32>
    %331 = vector.broadcast %8 : vector<1x32xf32> to vector<16x32xf32>
    %332 = arith.addf %330, %331 : vector<16x32xf32>
    %333 = arith.addf %208, %332 : vector<16x32xf32>
    %cst_90 = arith.constant dense<0.000000e+00> : vector<16xf32>
    %334 = vector.multi_reduction <add>, %333, %cst_90 [1] : vector<16x32xf32> to vector<16xf32>
    %335 = vector.shape_cast %334 : vector<16xf32> to vector<16x1xf32>
    %cst_91 = arith.constant 3.200000e+01 : f32
    %336 = vector.broadcast %cst_91 : f32 to vector<16x1xf32>
    %337 = arith.divf %335, %336 : vector<16x1xf32>
    %338 = vector.broadcast %337 : vector<16x1xf32> to vector<16x32xf32>
    %339 = arith.subf %333, %338 : vector<16x32xf32>
    %340 = arith.mulf %339, %339 : vector<16x32xf32>
    %cst_92 = arith.constant dense<0.000000e+00> : vector<16xf32>
    %341 = vector.multi_reduction <add>, %340, %cst_92 [1] : vector<16x32xf32> to vector<16xf32>
    %342 = vector.shape_cast %341 : vector<16xf32> to vector<16x1xf32>
    %cst_93 = arith.constant 3.200000e+01 : f32
    %343 = vector.broadcast %cst_93 : f32 to vector<16x1xf32>
    %344 = arith.divf %342, %343 : vector<16x1xf32>
    %345 = vector.broadcast %337 : vector<16x1xf32> to vector<16x32xf32>
    %346 = arith.subf %333, %345 : vector<16x32xf32>
    %cst_94 = arith.constant 9.99999974E-6 : f32
    %347 = vector.broadcast %cst_94 : f32 to vector<16x1xf32>
    %348 = arith.addf %344, %347 : vector<16x1xf32>
    %349 = math.rsqrt %348 : vector<16x1xf32>
    %350 = vector.broadcast %349 : vector<16x1xf32> to vector<16x32xf32>
    %351 = arith.mulf %346, %350 : vector<16x32xf32>
    %352 = vector.broadcast %9 : vector<1x32xf32> to vector<16x32xf32>
    %353 = arith.mulf %351, %352 : vector<16x32xf32>
    %354 = vector.broadcast %10 : vector<1x32xf32> to vector<16x32xf32>
    %355 = arith.addf %353, %354 : vector<16x32xf32>
    %cst_95 = arith.constant dense<0.000000e+00> : vector<16x64xf32>
    %356 = tpu.matmul %355, %20, %cst_95 {dimension_numbers = #tpu.dot_dimension_numbers<[1], [0], [0], [1], [0, 0, 1, 1], [], []>} : vector<16x32xf32>, vector<32x64xf32>, vector<16x64xf32> -> vector<16x64xf32>
    %357 = vector.broadcast %11 : vector<1x64xf32> to vector<16x64xf32>
    %358 = arith.addf %356, %357 : vector<16x64xf32>
    %cst_96 = arith.constant 0.000000e+00 : f32
    %359 = vector.broadcast %cst_96 : f32 to vector<16x64xf32>
    %360 = arith.maximumf %358, %359 : vector<16x64xf32>
    %cst_97 = arith.constant dense<0.000000e+00> : vector<16x32xf32>
    %361 = tpu.matmul %360, %21, %cst_97 {dimension_numbers = #tpu.dot_dimension_numbers<[1], [0], [0], [1], [0, 0, 1, 1], [], []>} : vector<16x64xf32>, vector<64x32xf32>, vector<16x32xf32> -> vector<16x32xf32>
    %362 = vector.broadcast %12 : vector<1x32xf32> to vector<16x32xf32>
    %363 = arith.addf %361, %362 : vector<16x32xf32>
    %364 = arith.addf %355, %363 : vector<16x32xf32>
    %cst_98 = arith.constant dense<0.000000e+00> : vector<16xf32>
    %365 = vector.multi_reduction <add>, %364, %cst_98 [1] : vector<16x32xf32> to vector<16xf32>
    %366 = vector.shape_cast %365 : vector<16xf32> to vector<16x1xf32>
    %cst_99 = arith.constant 3.200000e+01 : f32
    %367 = vector.broadcast %cst_99 : f32 to vector<16x1xf32>
    %368 = arith.divf %366, %367 : vector<16x1xf32>
    %369 = vector.broadcast %368 : vector<16x1xf32> to vector<16x32xf32>
    %370 = arith.subf %364, %369 : vector<16x32xf32>
    %371 = arith.mulf %370, %370 : vector<16x32xf32>
    %cst_100 = arith.constant dense<0.000000e+00> : vector<16xf32>
    %372 = vector.multi_reduction <add>, %371, %cst_100 [1] : vector<16x32xf32> to vector<16xf32>
    %373 = vector.shape_cast %372 : vector<16xf32> to vector<16x1xf32>
    %cst_101 = arith.constant 3.200000e+01 : f32
    %374 = vector.broadcast %cst_101 : f32 to vector<16x1xf32>
    %375 = arith.divf %373, %374 : vector<16x1xf32>
    %376 = vector.broadcast %368 : vector<16x1xf32> to vector<16x32xf32>
    %377 = arith.subf %364, %376 : vector<16x32xf32>
    %cst_102 = arith.constant 9.99999974E-6 : f32
    %378 = vector.broadcast %cst_102 : f32 to vector<16x1xf32>
    %379 = arith.addf %375, %378 : vector<16x1xf32>
    %380 = math.rsqrt %379 : vector<16x1xf32>
    %381 = vector.broadcast %380 : vector<16x1xf32> to vector<16x32xf32>
    %382 = arith.mulf %377, %381 : vector<16x32xf32>
    %383 = vector.broadcast %13 : vector<1x32xf32> to vector<16x32xf32>
    %384 = arith.mulf %382, %383 : vector<16x32xf32>
    %385 = vector.broadcast %14 : vector<1x32xf32> to vector<16x32xf32>
    %386 = arith.addf %384, %385 : vector<16x32xf32>
    %c0_103 = arith.constant 0 : index
    %c0_104 = arith.constant 0 : index
    %c0_105 = arith.constant 0 : index
    %387 = vector.load %arg5[%c0_103, %c0_104, %c0_105] : memref<3x16x32xf32, #tpu.memory_space<vmem>>, vector<1x16x32xf32>
    %388 = vector.shape_cast %387 : vector<1x16x32xf32> to vector<16x32xf32>
    %389 = vector.shape_cast %386 : vector<16x32xf32> to vector<1x16x32xf32>
    tpu.vector_store %arg5[%c0_103, %c0_104, %c0_105], %389 {strides = array<i32>} : memref<3x16x32xf32, #tpu.memory_space<vmem>>, vector<1x16x32xf32>,
    %c1 = arith.constant 1 : index
    %c0_106 = arith.constant 0 : index
    %c0_107 = arith.constant 0 : index
    %390 = vector.load %arg5[%c1, %c0_106, %c0_107] : memref<3x16x32xf32, #tpu.memory_space<vmem>>, vector<1x16x32xf32>
    %391 = vector.shape_cast %390 : vector<1x16x32xf32> to vector<16x32xf32>
    %392 = vector.shape_cast %70 : vector<16x32xf32> to vector<1x16x32xf32>
    tpu.vector_store %arg5[%c1, %c0_106, %c0_107], %392 {strides = array<i32>} : memref<3x16x32xf32, #tpu.memory_space<vmem>>, vector<1x16x32xf32>,
    %c2 = arith.constant 2 : index
    %c0_108 = arith.constant 0 : index
    %c0_109 = arith.constant 0 : index
    %393 = vector.load %arg5[%c2, %c0_108, %c0_109] : memref<3x16x32xf32, #tpu.memory_space<vmem>>, vector<1x16x32xf32>
    %394 = vector.shape_cast %393 : vector<1x16x32xf32> to vector<16x32xf32>
    %395 = vector.shape_cast %71 : vector<16x32xf32> to vector<1x16x32xf32>
    tpu.vector_store %arg5[%c2, %c0_108, %c0_109], %395 {strides = array<i32>} : memref<3x16x32xf32, #tpu.memory_space<vmem>>, vector<1x16x32xf32>,
    return
  }
}

</mosaic_0001>

<bundles_post_ra>
// kernel: tpu_custom_call.1
= control target key start
LH: loop header
LB: loop body
LE: loop exit
PB: predicated region body
PF: predicated region fallthrough
CT: control target
= control target key end

     0   :  { %10 = vsyncpa [#allocation3], 0  ;;  %s3957_s0 = inlined_call_operand.hbm [shape: f32[16,32], index: 0, kind: input, shape index: {}]   ;;  %s3958_s1 = inlined_call_operand.hbm [shape: f32[16,32], index: 1, kind: input, shape index: {}]   ;;  %s3959_s2 = inlined_call_operand.vmem [shape: f32[32,320], index: 2, kind: input, shape index: {}]   ;;  %s3960_s3 = inlined_call_operand.vmem [shape: f32[64,32], index: 3, kind: input, shape index: {}]   ;;  %s3961_s4 = inlined_call_operand.hbm [shape: f32[12,96], index: 4, kind: input, shape index: {}]   ;;  %s3962_s5 = inlined_call_operand.hbm [shape: f32[3,16,32], index: 5, kind: output, shape index: {}]  }
   0x1   :  { %11 = vsyncpa [#allocation6], 0 }
   0x2   :  { %12 = vsyncpa [#allocation4], 0  ;;  %s3383_s18 = smov [#allocation5]   ;;  %s3384_s20 = smov [#allocation2]  }
   0x3   :  { %s30_s19 = sshll.u32 %s3383_s18, 4  ;;  %s18_s21 = sshll.u32 %s3384_s20, 4  ;;  %s31_s19 = int_to_ptr.vmem [resolvable:$true] %s30_s19  ;;  %s3424_s21 = int_to_ptr.vmem [resolvable:$true] %s18_s21 }
   0x4   :  { %s3289_s24 = scalar_lea.hbm %s3958_s1, 256 }
   0x5   :  { %p3290_p0 = scmp.ne.s32.totalorder %s3958_s1, %s3289_s24  ;;  %p3293_p1 = scmp.lt.u32.totalorder %s3289_s24, %s3958_s1 }
   0x7   :  { %p3295_p2 = pnand %p3293_p1, %p3290_p0 }
   0x9   :  { %3298 = shalt.err (!%p3295_p2)
}
   0xa   :  { %s3299_s29 = scalar_lea.vmem %s31_s19, 256  ;;  %p3304_p4 = scmp.lt.s32.totalorder %s31_s19, %s31_s19 }
   0xb   :  { %p3300_p3 = scmp.ne.s32.totalorder %s31_s19, %s3299_s29  ;;  %p3305_p5 = scmp.lt.s32.totalorder %s3299_s29, %s3299_s29 }
   0xd   :  { %p3306_p6 = por %p3305_p5, %p3304_p4 }
   0xf   :  { %p3307_p7 = pnand %p3306_p6, %p3300_p3 }
  0x11   :  { %3310 = shalt.err (!%p3307_p7)
}
  0x12   :  { %s3385_s30 = smov 128   ;;  %s3386_s6 = smov 8  }
  0x13   :  { %36 = dma.hbm_to_vmem [thread:$0]  %s3958_s1, 256, %s31_s19, [#allocation6], %s3385_s30, %s3385_s30, %s3386_s6  }
  0x14   :  { %s3311_s11 = scalar_lea.hbm %s3957_s0, 256 }
  0x15   :  { %p3312_p8 = scmp.ne.s32.totalorder %s3957_s0, %s3311_s11  ;;  %p3315_p9 = scmp.lt.u32.totalorder %s3311_s11, %s3957_s0 }
  0x17   :  { %p3317_p10 = pnand %p3315_p9, %p3312_p8 }
  0x19   :  { %3320 = shalt.err (!%p3317_p10)
}
  0x1a   :  { %s3321_s16 = scalar_lea.vmem %s3424_s21, 256  ;;  %p3326_p12 = scmp.lt.s32.totalorder %s3424_s21, %s3424_s21 }
  0x1b   :  { %p3322_p11 = scmp.ne.s32.totalorder %s3424_s21, %s3321_s16  ;;  %p3327_p13 = scmp.lt.s32.totalorder %s3321_s16, %s3321_s16 }
  0x1d   :  { %p3328_p0 = por %p3327_p13, %p3326_p12 }
  0x1f   :  { %p3329_p1 = pnand %p3328_p0, %p3322_p11 }
  0x21   :  { %3332 = shalt.err (!%p3329_p1)
}
  0x22   :  { %24 = dma.hbm_to_vmem [thread:$0]  %s3957_s0, 256, %s3424_s21, [#allocation3], %s3385_s30, %s3385_s30, %s3386_s6  }
  0x23   :  { %s3387_s18 = smov [#allocation7]   ;;  %s3333_s23 = scalar_lea.hbm %s3961_s4, 256 }
  0x24   :  { %s46_s19 = sshll.u32 %s3387_s18, 4  ;;  %p3334_p2 = scmp.ne.s32.totalorder %s3961_s4, %s3333_s23  ;;  %s47_s19 = int_to_ptr.vmem [resolvable:$true] %s46_s19 }
  0x25   :  { %p3337_p3 = scmp.lt.u32.totalorder %s3333_s23, %s3961_s4 }
  0x27   :  { %p3339_p4 = pnand %p3337_p3, %p3334_p2 }
  0x29   :  { %3342 = shalt.err (!%p3339_p4)
}
  0x2a   :  { %s3343_s28 = scalar_lea.vmem %s47_s19, 256  ;;  %p3348_p6 = scmp.lt.s32.totalorder %s47_s19, %s47_s19 }
  0x2b   :  { %p3344_p5 = scmp.ne.s32.totalorder %s47_s19, %s3343_s28  ;;  %p3349_p7 = scmp.lt.s32.totalorder %s3343_s28, %s3343_s28 }
  0x2d   :  { %p3350_p8 = por %p3349_p7, %p3348_p6 }
  0x2f   :  { %p3351_p9 = pnand %p3350_p8, %p3344_p5 }
  0x31   :  { %3354 = shalt.err (!%p3351_p9)
}
  0x32   :  { %52 = dma.hbm_to_vmem [thread:$0]  %s3961_s4, 256, %s47_s19, [#allocation6], %s3385_s30, %s3385_s30, %s3386_s6  }
  0x33   :  { %3377 = dma.done.wait [#allocation3], 256  }
  0x34   :  { %3378 = vsyncadd [#allocation3], 4294967040 }
  0x35   :  { %3379 = dma.done.wait [#allocation6], 512  }
  0x36   :  { %3380 = vsyncadd [#allocation6], 4294966784  ;;  %vm125_vm0 = vcmask 261120   ;;  %v3479_v0 = vld [vmem:[%s3959_s2] sm:$0xff]  ;;  %v3484_v1 = vld [vmem:[%s3959_s2 + $0x18] sm:$0xff]  ;;  %v88_v9 = vlaneseq  ;;  %v3388_v17 = vmov 0.0  }
  0x37   :  { %v3489_v2 = vld [vmem:[%s3959_s2 + $0x30] sm:$0xff]  ;;  %v3152_v3 = vpack.i.bf16 %v3484_v1, %v3479_v0  ;;  %v2965_v4 = vpack.c.bf16 %v3484_v1, %v3479_v0  ;;  %v3498_v5 = vld [vmem:[%s3959_s2 + $0x48] sm:$0xff]  ;;  %v3500_v6 = vld [vmem:[#allocation2] sm:$0xff]  ;;  %s3389_s13 = smov 96   ;;  %v3390_v56 = vmov -1e+09  }
  0x38   :  { %v2969_v7 = vpack.c.bf16 %v3498_v5, %v3489_v2  ;;  %2776 = vmatprep.mubr.msk.f32.mxu1 %vm125_vm0, %v3500_v6  ;;  %v3506_v8 = vld [vmem:[#allocation2 + $0x8] sm:$0xff]  ;;  %v3510_v10 = vshrl.u32 %v88_v9, 7  ;;  %v3512_v11 = vand.u32 127, %v88_v9  ;;  %v3515_v13 = vld [vmem:[#allocation7] sm:$0xff]  ;;  %vm3546_vm5 = vmpackc.low %vm125_vm0, %vm125_vm0  ;;  %vm309_vm15 = vcmask 130048   ;;  %s3391_s14 = smov 64  }
  0x39   :  { %2966 = vmatprep.subr.bf16.mxu1 %v2965_v4  ;;  %s3392_s15 = smov 32  }
  0x3a   :  { %2968 = vmatpush3.bf16.msra.mxu1 %v2965_v4  ;;  %v123_v12 = vsub.s32 0, %v3510_v10  ;;  %vm338_vm1 = vcmp.ge.s32.totalorder %v3512_v11, 8  ;;  %vm339_vm2 = vcmp.lt.s32.totalorder %v3512_v11, 16  ;;  %vm208_vm3 = vcmp.lt.s32.totalorder %v3512_v11, 8 }
  0x3b   :  { %2970 = vmatprep.subr.bf16.mxu1 %v2969_v7  ;;  %vm340_vm4 = vmand %vm338_vm1, %vm339_vm2  ;;  %v3524_v18 = vsel %vm208_vm3, 1.0, %v3388_v17  ;;  %vm636_vm6 = vcmp.ge.s32.totalorder %v3512_v11, 16  ;;  %vm637_vm7 = vcmp.lt.s32.totalorder %v3512_v11, 24  ;;  %v90_v33 = vadd.s32 8, %v3510_v10 }
  0x3c   :  { %v124_v14 = vrot.slane %v3515_v13, %v123_v12  ;;  %v3527_v19 = vsel %vm340_vm4, 1.0, %v3388_v17  ;;  %vm638_vm8 = vmand %vm636_vm6, %vm637_vm7  ;;  %v95_v35 = vcvt.s32.f32 %v3512_v11  ;;  %v91_v36 = vcvt.s32.f32 %v3510_v10 }
  0x3d   :  { %v3571_v28 = vsel %vm638_vm8, 1.0, %v3388_v17  ;;  %v92_v34 = vcvt.s32.f32 %v90_v33  ;;  %vm847_vm1 = vcmp.ge.s32.totalorder %v3512_v11, 24  ;;  %vm848_vm2 = vcmp.lt.s32.totalorder %v3512_v11, 32 }
  0x3e   :  { %2972 = vmatpush3.bf16.msra.mxu1 %v2969_v7  ;;  %v102_v38 = vadd.f32 0.5, %v95_v35  ;;  %v96_v39 = vadd.f32 0.5, %v91_v36  ;;  %vm849_vm3 = vmand %vm847_vm1, %vm848_vm2  ;;  %vm2436_vm4 = vcmask 523264  }
  0x3f   :  { %v97_v37 = vadd.f32 0.5, %v92_v34 }
  0x40   :  { %v103_v41 = vmul.f32 0.125, %v102_v38  ;;  %v98_v42 = vmul.f32 0.125, %v96_v39 }
  0x41   :  { %2777 = vmatmul.mubr.msk.f32.vlgmr.msra.gmra.mrb[0].mxu1 %vm125_vm0, %v3506_v8  ;;  %v99_v40 = vmul.f32 0.125, %v97_v37 }
  0x42   :  { %v104_v44 = vfloor.f32 %v103_v41  ;;  %v100_v45 = vfloor.f32 %v98_v42 }
  0x43   :  { %v101_v43 = vfloor.f32 %v99_v40 }
  0x44   :  { %v107_v46 = vmul.f32 8.0, %v104_v44  ;;  %v109_v48 = vmul.f32 8.0, %v100_v45  ;;  %vm3595_vm11 = vcmp.eq.f32.partialorder %v100_v45, %v104_v44 }
  0x45   :  { %v110_v47 = vmul.f32 8.0, %v101_v43  ;;  %vm3591_vm9 = vcmp.eq.f32.partialorder %v101_v43, %v104_v44  ;;  %v119_v26 = vsel %vm3595_vm11, 0.0, %v3390_v56 }
  0x46   :  { %v108_v49 = vsub.f32 %v95_v35, %v107_v46  ;;  %v111_v51 = vsub.f32 %v91_v36, %v109_v48 }
  0x47   :  { %v112_v50 = vsub.f32 %v92_v34, %v110_v47 }
  0x48   :  { %vm113_vm12 = vcmp.le.f32.partialorder %v108_v49, %v111_v51 }
  0x49   :  { %vm114_vm10 = vcmp.le.f32.partialorder %v108_v49, %v112_v50  ;;  %vm115_vm14 = vmand %vm3595_vm11, %vm113_vm12 }
  0x4a   :  { %vm116_vm13 = vmand %vm3591_vm9, %vm114_vm10  ;;  %v3607_v61 = vsel %vm115_vm14, 0.0, %v3390_v56 }
  0x4b   :  { %v3604_v57 = vsel %vm116_vm13, 0.0, %v3390_v56 }
 0x114   :  { %v2778_v15 = vpop.f32.mrb[0].mxu1 }
 0x115   :  { %v198_v16 = vpop.f32.mrb[1].mxu1  ;;  %v3537_v23 = vadd.f32 %v2778_v15, %v124_v14 }
 0x116   :  { %v3529_v20 = vadd.f32 %v198_v16, %v124_v14 }
 0x117   :  { %v213_v29 = vmul.f32 %v3524_v18, %v3537_v23  ;;  %v344_v30 = vmul.f32 %v3527_v19, %v3537_v23  ;;  %v642_v32 = vmul.f32 %v3571_v28, %v3537_v23 }
 0x118   :  { %216 = vrot.lane.b32.xlu0 %v3529_v20, %s3389_s13  ;;  %v212_v21 = vmul.f32 %v3524_v18, %v3529_v20  ;;  %v343_v22 = vmul.f32 %v3527_v19, %v3529_v20  ;;  %v641_v31 = vmul.f32 %v3571_v28, %v3529_v20 }
 0x11a   :  { %2783 = vmatprep.mubr.msk.f32.mxu1 %vm125_vm0, %v212_v21  ;;  %2790 = vmatprep.mubr.msk.f32.mxu0 %vm125_vm0, %v343_v22 }
 0x11c   :  { %218 = vrot.lane.b32.xlu0 %v3537_v23, %s3389_s13 }
 0x18a   :  { %v217_v24 = vpop.permute.xlu0 %216 }
 0x18b   :  { %2563 = vst.msk [vmem:[#allocation8 + $0x10] sm:$0xff] %vm125_vm0, %v217_v24 }
 0x18e   :  { %v219_v25 = vpop.permute.xlu0 %218 }
 0x18f   :  { %v3550_v27 = vpack.c.bf16 %v219_v25, %v217_v24  ;;  %2564 = vst.msk [vmem:[#allocation8 + $0x18] sm:$0xff] %vm125_vm0, %v219_v25 }
 0x191   :  { %2975 = vmatprep.subr.msk.bf16.mxu1 %vm3546_vm5, %v3550_v27  ;;  %2981 = vmatprep.subr.msk.bf16.mxu0 %vm3546_vm5, %v3550_v27 }
 0x192   :  { %2978 = vmatpush3.bf16.xpose.msk.msra.mxu1 %vm3546_vm5, %v3550_v27  ;;  %2984 = vmatpush3.bf16.xpose.msk.msra.mxu0 %vm3546_vm5, %v3550_v27 }
 0x193   :  { %2995 = vmatprep.subr.msk.bf16.mxu0 %vm3546_vm5, %v3550_v27 }
 0x199   :  { %2784 = vmatmul.mubr.msk.f32.vlgmr.msra.gmra.mrb[2].mxu1 %vm125_vm0, %v213_v29  ;;  %2791 = vmatmul.mubr.msk.f32.vlgmr.msra.gmra.mrb[0].mxu0 %vm125_vm0, %v344_v30 }
 0x19a   :  { %2998 = vmatpush3.bf16.xpose.msk.msra.mxu0 %vm3546_vm5, %v3550_v27  ;;  %2811 = vmatprep.mubr.msk.f32.mxu0 %vm125_vm0, %v641_v31 }
 0x1a1   :  { %2812 = vmatmul.mubr.msk.f32.vlgmr.msra.gmra.mrb[2].mxu0 %vm125_vm0, %v642_v32 }
 0x26c   :  { %v2785_v54 = vpop.f32.mrb[2].mxu1  ;;  %v2792_v55 = vpop.f32.mrb[0].mxu0 }
 0x26d   :  { %v427_v58 = vmul.f32 0.35355338, %v2792_v55  ;;  %v296_v59 = vpop.f32.mrb[3].mxu1  ;;  %v417_v60 = vpop.f32.mrb[1].mxu0  ;;  %v306_v9 = vmul.f32 0.35355338, %v2785_v54 }
 0x26e   :  { %v305_v62 = vmul.f32 0.35355338, %v296_v59  ;;  %v426_v63 = vmul.f32 0.35355338, %v417_v60 }
 0x26f   :  { %v429_v4 = vadd.f32 %v427_v58, %v3604_v57  ;;  %v308_v25 = vadd.f32 %v306_v9, %v3604_v57 }
 0x270   :  { %v307_v7 = vadd.f32 %v305_v62, %v3607_v61  ;;  %v428_v15 = vadd.f32 %v426_v63, %v3607_v61 }
 0x271   :  { %v433_v14 = vsel %vm309_vm15, %v429_v4, -inf  ;;  %v313_v29 = vsel %vm309_vm15, %v308_v25, -inf }
 0x272   :  { %434 = vmax.xlane.f32.xlu1 %v433_v14  ;;  %v310_v16 = vsel %vm309_vm15, %v307_v7, -inf  ;;  %v430_v24 = vsel %vm309_vm15, %v428_v15, -inf }
 0x273   :  { %311 = vmax.xlane.f32.xlu0 %v310_v16 }
 0x274   :  { %v2813_v21 = vpop.f32.mrb[2].mxu0 }
 0x275   :  { %v715_v22 = vpop.f32.mrb[3].mxu0  ;;  %v725_v30 = vmul.f32 0.35355338, %v2813_v21 }
 0x276   :  { %431 = vmax.xlane.f32.xlu1 %v430_v24  ;;  %v724_v31 = vmul.f32 0.35355338, %v715_v22 }
 0x277   :  { %v727_v32 = vadd.f32 %v725_v30, %v3604_v57 }
 0x278   :  { %v726_v34 = vadd.f32 %v724_v31, %v3607_v61 }
 0x279   :  { %v731_v33 = vsel %vm309_vm15, %v727_v32, -inf }
 0x27a   :  { %314 = vmax.xlane.f32.xlu1 %v313_v29  ;;  %v728_v35 = vsel %vm309_vm15, %v726_v34, -inf }
 0x289   :  { %751 = vrot.lane.b32.xlu0 %v3571_v28, %s3391_s14 }
 0x28b   :  { %453 = vrot.lane.b32.xlu1 %v3527_v19, %s3391_s14 }
 0x28f   :  { %333 = vrot.lane.b32.xlu1 %v3524_v18, %s3391_s14 }
 0x2b3   :  { %732 = vmax.xlane.f32.xlu1 %v731_v33 }
 0x2b7   :  { %729 = vmax.xlane.f32.xlu1 %v728_v35 }
 0x2ff   :  { %v435_v36 = vpop.xlane.xlu1 %434 }
 0x300   :  { %v437_v37 = vsub.f32 %v429_v4, %v435_v36  ;;  %v312_v58 = vpop.xlane.xlu0 %311 }
 0x301   :  { %v316_v59 = vsub.f32 %v307_v7, %v312_v58 }
 0x302   :  { %v440_v38 = vmul.f32 1.442695, %v437_v37 }
 0x303   :  { %v432_v39 = vpop.xlane.xlu1 %431  ;;  %v318_v62 = vmul.f32 1.442695, %v316_v59 }
 0x304   :  { %3212 = vpow2.f32 %v440_v38  ;;  %v436_v54 = vsub.f32 %v428_v15, %v432_v39  ;;  %v752_v36 = vpop.permute.xlu0 %751 }
 0x305   :  { %v754_v37 = vmul.f32 %v752_v36, %v3529_v20  ;;  %v755_v38 = vmul.f32 %v752_v36, %v3537_v23 }
 0x306   :  { %v438_v60 = vmul.f32 1.442695, %v436_v54 }
 0x307   :  { %v315_v40 = vpop.xlane.xlu1 %314 }
 0x308   :  { %v317_v50 = vsub.f32 %v308_v25, %v315_v40 }
 0x30a   :  { %v320_v55 = vmul.f32 1.442695, %v317_v50 }
 0x30b   :  { %v454_v41 = vpop.permute.xlu1 %453 }
 0x30c   :  { %v456_v48 = vmul.f32 %v454_v41, %v3529_v20  ;;  %v457_v49 = vmul.f32 %v454_v41, %v3537_v23  ;;  %3214 = vpow2.f32 %v320_v55 }
 0x30d   :  { %3216 = vpow2.f32 %v438_v60 }
 0x30e   :  { %v3627_v42 = vpop.eup %3212  ;;  %v3132_v51 = vpack.i.bf16 %v457_v49, %v456_v48  ;;  %3218 = vpow2.f32 %v318_v62 }
 0x30f   :  { %v334_v43 = vpop.permute.xlu1 %333  ;;  %v445_v44 = vsel %vm309_vm15, %v3627_v42, 0.0 }
 0x310   :  { %v336_v45 = vmul.f32 %v334_v43, %v3529_v20  ;;  %v337_v46 = vmul.f32 %v334_v43, %v3537_v23  ;;  %446 = vadd.xlane.f32.xlu0 %v445_v44 }
 0x312   :  { %v3137_v47 = vpack.i.bf16 %v337_v46, %v336_v45 }
 0x314   :  { %3138 = vrot.lane.b32.xlu1 %v3137_v47, %s3391_s14 }
 0x316   :  { %v3215_v63 = vpop.eup %3214 }
 0x317   :  { %v325_v4 = vsel %vm309_vm15, %v3215_v63, 0.0  ;;  %v3217_v9 = vpop.eup %3216 }
 0x318   :  { %v442_v14 = vsel %vm309_vm15, %v3217_v9, 0.0  ;;  %v3219_v16 = vpop.eup %3218 }
 0x319   :  { %v322_v15 = vsel %vm309_vm15, %v3219_v16, 0.0 }
 0x326   :  { %3133 = vrot.lane.b32.xlu0 %v3132_v51, %s3391_s14 }
 0x338   :  { %326 = vadd.xlane.f32.xlu1 %v325_v4 }
 0x33c   :  { %443 = vadd.xlane.f32.xlu1 %v442_v14 }
 0x340   :  { %v733_v21 = vpop.xlane.xlu1 %732  ;;  %323 = vadd.xlane.f32.xlu1 %v322_v15 }
 0x341   :  { %v735_v22 = vsub.f32 %v727_v32, %v733_v21  ;;  %v3142_v32 = vpack.i.bf16 %v755_v38, %v754_v37 }
 0x343   :  { %v738_v7 = vmul.f32 1.442695, %v735_v22 }
 0x344   :  { %v730_v24 = vpop.xlane.xlu1 %729 }
 0x345   :  { %3220 = vpow2.f32 %v738_v7  ;;  %v734_v25 = vsub.f32 %v726_v34, %v730_v24 }
 0x347   :  { %v736_v29 = vmul.f32 1.442695, %v734_v25 }
 0x349   :  { %3222 = vpow2.f32 %v736_v29 }
 0x34f   :  { %v3221_v30 = vpop.eup %3220 }
 0x350   :  { %v743_v31 = vsel %vm309_vm15, %v3221_v30, 0.0 }
 0x351   :  { %744 = vadd.xlane.f32.xlu1 %v743_v31 }
 0x353   :  { %v3223_v33 = vpop.eup %3222 }
 0x354   :  { %v740_v35 = vsel %vm309_vm15, %v3223_v33, 0.0 }
 0x355   :  { %741 = vadd.xlane.f32.xlu1 %v740_v35 }
 0x366   :  { %3143 = vrot.lane.b32.xlu1 %v3142_v32, %s3391_s14 }
 0x386   :  { %v3139_v34 = vpop.permute.xlu1 %3138 }
 0x387   :  { %v3141_v41 = vunpack.i.h.bf16 %v3139_v34  ;;  %v3140_v43 = vunpack.i.l.bf16 %v3139_v34 }
 0x389   :  { %v2989_v47 = vpack.c.bf16 %v3141_v41, %v3140_v43 }
 0x39d   :  { %v447_v39 = vpop.xlane.xlu0 %446 }
 0x39e   :  { %3224 = vrcp.f32 %v447_v39 }
 0x3a1   :  { %v3134_v40 = vpop.permute.xlu0 %3133 }
 0x3a2   :  { %v3136_v44 = vunpack.i.h.bf16 %v3134_v40  ;;  %v3135_v45 = vunpack.i.l.bf16 %v3134_v40 }
 0x3a4   :  { %v2985_v46 = vpack.c.bf16 %v3136_v44, %v3135_v45 }
 0x3a6   :  { %2986 = vmatprep.subr.bf16.mxu1 %v2985_v46 }
 0x3a7   :  { %2988 = vmatpush3.bf16.msra.mxu1 %v2985_v46 }
 0x3a8   :  { %2990 = vmatprep.subr.bf16.mxu1 %v2989_v47  ;;  %v3225_v51 = vpop.eup %3224 }
 0x3a9   :  { %v451_v58 = vmul.f32 %v3225_v51, %v3627_v42 }
 0x3c5   :  { %v327_v48 = vpop.xlane.xlu1 %326 }
 0x3c9   :  { %v444_v49 = vpop.xlane.xlu1 %443 }
 0x3ca   :  { %3226 = vrcp.f32 %v444_v49  ;;  %v3157_v49 = vpack.i.bf16 %v3498_v5, %v3489_v2 }
 0x3cd   :  { %v324_v50 = vpop.xlane.xlu1 %323 }
 0x3ce   :  { %3228 = vrcp.f32 %v324_v50 }
 0x3cf   :  { %3230 = vrcp.f32 %v327_v48 }
 0x3d4   :  { %v3227_v54 = vpop.eup %3226 }
 0x3d5   :  { %v450_v55 = vmul.f32 %v3227_v54, %v3217_v9 }
 0x3d7   :  { %2797 = vmatprep.mubr.msk.f32.mxu1 %vm309_vm15, %v450_v55 }
 0x3d8   :  { %v3229_v59 = vpop.eup %3228  ;;  %2798 = vmatmul.mubr.msk.f32.vlgmr.msra.gmra.mrb[4].mxu1 %vm309_vm15, %v451_v58 }
 0x3d9   :  { %2992 = vmatpush3.bf16.msra.mxu1 %v2989_v47  ;;  %v330_v60 = vmul.f32 %v3229_v59, %v3219_v16  ;;  %v3231_v62 = vpop.eup %3230 }
 0x3da   :  { %v331_v4 = vmul.f32 %v3231_v62, %v3215_v63  ;;  %v3656_v63 = vsel %vm849_vm3, 1.0, %v3388_v17 }
 0x3db   :  { %2804 = vmatprep.mubr.msk.f32.mxu1 %vm309_vm15, %v330_v60  ;;  %v852_v11 = vmul.f32 %v3656_v63, %v3529_v20  ;;  %v853_v29 = vmul.f32 %v3656_v63, %v3537_v23 }
 0x3de   :  { %v745_v14 = vpop.xlane.xlu1 %744 }
 0x3df   :  { %3232 = vrcp.f32 %v745_v14 }
 0x3e0   :  { %2805 = vmatmul.mubr.msk.f32.vlgmr.msra.gmra.mrb[4].mxu1 %vm309_vm15, %v331_v4 }
 0x3e2   :  { %v742_v15 = vpop.xlane.xlu1 %741 }
 0x3e3   :  { %3234 = vrcp.f32 %v742_v15 }
 0x3e6   :  { %v3144_v9 = vpop.permute.xlu1 %3143 }
 0x3e7   :  { %v3146_v21 = vunpack.i.h.bf16 %v3144_v9  ;;  %v3145_v42 = vunpack.i.l.bf16 %v3144_v9 }
 0x3e9   :  { %v2999_v22 = vpack.c.bf16 %v3146_v21, %v3145_v42  ;;  %v3233_v16 = vpop.eup %3232 }
 0x3ea   :  { %v749_v25 = vmul.f32 %v3233_v16, %v3221_v30  ;;  %v1060_v16 = vsub.s32 1, %v3510_v10 }
 0x3eb   :  { %3000 = vmatprep.subr.bf16.mxu1 %v2999_v22 }
 0x3ec   :  { %3002 = vmatpush3.bf16.msra.mxu1 %v2999_v22 }
 0x3ed   :  { %v3235_v7 = vpop.eup %3234  ;;  %3005 = vmatprep.subr.msk.bf16.mxu1 %vm3546_vm5, %v3550_v27 }
 0x3ee   :  { %v748_v24 = vmul.f32 %v3235_v7, %v3223_v33  ;;  %v1061_v7 = vrot.slane %v3515_v13, %v1060_v16 }
 0x3f0   :  { %2818 = vmatprep.mubr.msk.f32.mxu1 %vm309_vm15, %v748_v24 }
 0x3f1   :  { %2819 = vmatmul.mubr.msk.f32.vlgmr.msra.gmra.mrb[4].mxu1 %vm309_vm15, %v749_v25 }
 0x3f2   :  { %2825 = vmatprep.mubr.msk.f32.mxu1 %vm125_vm0, %v852_v11 }
 0x3f5   :  { %3008 = vmatpush3.bf16.xpose.msk.msra.mxu1 %vm3546_vm5, %v3550_v27 }
 0x3fc   :  { %2826 = vmatmul.mubr.msk.f32.vlgmr.msra.gmra.mrb[6].mxu1 %vm125_vm0, %v853_v29 }
 0x4cf   :  { %v2827_v17 = vpop.f32.mrb[6].mxu1 }
 0x4d0   :  { %v936_v30 = vmul.f32 0.35355338, %v2827_v17  ;;  %v926_v31 = vpop.f32.mrb[7].mxu1 }
 0x4d1   :  { %v935_v33 = vmul.f32 0.35355338, %v926_v31 }
 0x4d2   :  { %v938_v35 = vadd.f32 %v936_v30, %v3604_v57 }
 0x4d3   :  { %v937_v36 = vadd.f32 %v935_v33, %v3607_v61 }
 0x4d4   :  { %v942_v37 = vsel %vm309_vm15, %v938_v35, -inf }
 0x4d5   :  { %943 = vmax.xlane.f32.xlu1 %v942_v37  ;;  %v939_v38 = vsel %vm309_vm15, %v937_v36, -inf }
 0x4d6   :  { %940 = vmax.xlane.f32.xlu0 %v939_v38 }
 0x4ec   :  { %962 = vrot.lane.b32.xlu0 %v3656_v63, %s3391_s14 }
 0x4f0   :  { %3153 = vrot.lane.b32.xlu0 %v3152_v3, %s3392_s15 }
 0x4f4   :  { %3158 = vrot.lane.b32.xlu0 %v3157_v49, %s3392_s15  ;;  %v64_v49 = vld [vmem:[#allocation5] sm:$0xff] }
 0x562   :  { %v944_v27 = vpop.xlane.xlu1 %943 }
 0x563   :  { %v946_v32 = vsub.f32 %v938_v35, %v944_v27  ;;  %v941_v39 = vpop.xlane.xlu0 %940  ;;  %v72_v35 = vld [vmem:[%s3959_s2 + $0x8] sm:$0xff] }
 0x564   :  { %v945_v34 = vsub.f32 %v937_v36, %v941_v39  ;;  %v73_v36 = vld [vmem:[%s3959_s2 + $0x20] sm:$0xff] }
 0x565   :  { %v949_v40 = vmul.f32 1.442695, %v946_v32  ;;  %v3705_v37 = vpack.i.bf16 %v73_v36, %v72_v35 }
 0x566   :  { %v947_v41 = vmul.f32 1.442695, %v945_v34 }
 0x567   :  { %3236 = vpow2.f32 %v949_v40  ;;  %v963_v45 = vpop.permute.xlu0 %962 }
 0x568   :  { %3238 = vpow2.f32 %v947_v41  ;;  %v965_v46 = vmul.f32 %v963_v45, %v3529_v20  ;;  %v966_v47 = vmul.f32 %v963_v45, %v3537_v23 }
 0x56a   :  { %v3147_v48 = vpack.i.bf16 %v966_v47, %v965_v46 }
 0x56b   :  { %v3154_v54 = vpop.permute.xlu0 %3153 }
 0x56c   :  { %v3156_v55 = vunpack.i.h.bf16 %v3154_v54  ;;  %v3155_v58 = vunpack.i.l.bf16 %v3154_v54  ;;  %v1202_v54 = vsub.s32 4, %v3510_v10 }
 0x56e   :  { %v3013_v4 = vpack.c.bf16 %v3156_v55, %v3155_v58  ;;  %v1203_v55 = vrot.slane %v3515_v13, %v1202_v54 }
 0x56f   :  { %v3159_v14 = vpop.permute.xlu0 %3158 }
 0x570   :  { %v3161_v0 = vunpack.i.h.bf16 %v3159_v14  ;;  %v3160_v1 = vunpack.i.l.bf16 %v3159_v14  ;;  %3014 = vmatprep.subr.bf16.mxu0 %v3013_v4 }
 0x571   :  { %v3237_v57 = vpop.eup %3236  ;;  %3016 = vmatpush3.bf16.msra.mxu0 %v3013_v4 }
 0x572   :  { %v954_v61 = vsel %vm309_vm15, %v3237_v57, 0.0  ;;  %v3239_v43 = vpop.eup %3238  ;;  %v3017_v2 = vpack.c.bf16 %v3161_v0, %v3160_v1 }
 0x573   :  { %955 = vadd.xlane.f32.xlu1 %v954_v61  ;;  %v951_v44 = vsel %vm309_vm15, %v3239_v43, 0.0 }
 0x574   :  { %3018 = vmatprep.subr.bf16.mxu0 %v3017_v2 }
 0x575   :  { %3020 = vmatpush3.bf16.msra.mxu0 %v3017_v2 }
 0x577   :  { %952 = vadd.xlane.f32.xlu1 %v951_v44  ;;  %v75_v44 = vld [vmem:[%s3959_s2 + $0x50] sm:$0xff] }
 0x588   :  { %3148 = vrot.lane.b32.xlu1 %v3147_v48, %s3391_s14 }
 0x600   :  { %v956_v50 = vpop.xlane.xlu1 %955 }
 0x601   :  { %3240 = vrcp.f32 %v956_v50  ;;  %v3021_v50 = vpack.c.bf16 %v73_v36, %v72_v35 }
 0x603   :  { %3022 = vmatprep.subr.bf16.mxu0 %v3021_v50 }
 0x604   :  { %v953_v51 = vpop.xlane.xlu1 %952 }
 0x605   :  { %3242 = vrcp.f32 %v953_v51 }
 0x608   :  { %v3149_v59 = vpop.permute.xlu1 %3148 }
 0x609   :  { %v3151_v60 = vunpack.i.h.bf16 %v3149_v59  ;;  %v3150_v62 = vunpack.i.l.bf16 %v3149_v59 }
 0x60b   :  { %v3009_v15 = vpack.c.bf16 %v3151_v60, %v3150_v62  ;;  %v3241_v3 = vpop.eup %3240 }
 0x60c   :  { %v960_v21 = vmul.f32 %v3241_v3, %v3237_v57  ;;  %v1190_v3 = vsub.s32 2, %v3510_v10 }
 0x60d   :  { %3010 = vmatprep.subr.bf16.mxu1 %v3009_v15 }
 0x60e   :  { %3012 = vmatpush3.bf16.msra.mxu1 %v3009_v15 }
 0x60f   :  { %v3243_v5 = vpop.eup %3242 }
 0x610   :  { %v959_v9 = vmul.f32 %v3243_v5, %v3239_v43  ;;  %v74_v43 = vld [vmem:[%s3959_s2 + $0x38] sm:$0xff] }
 0x611   :  { %v3717_v48 = vpack.i.bf16 %v75_v44, %v74_v43  ;;  %v3025_v51 = vpack.c.bf16 %v75_v44, %v74_v43  ;;  %v65_v5 = vld [vmem:[#allocation5 + $0x8] sm:$0xff] }
 0x612   :  { %2832 = vmatprep.mubr.msk.f32.mxu1 %vm309_vm15, %v959_v9 }
 0x613   :  { %2833 = vmatmul.mubr.msk.f32.vlgmr.msra.gmra.mrb[4].mxu1 %vm309_vm15, %v960_v21 }
 0x614   :  { %2865 = vmatprep.mubr.msk.f32.mxu1 %vm125_vm0, %v64_v49 }
 0x6e6   :  { %v2834_v42 = vpop.f32.mrb[4].mxu1 }
 0x6e7   :  { %v1047_v22 = vpop.f32.mrb[5].mxu1 }
 0x6e8   :  { %2843 = vmatprep.mubr.msk.f32.mxu0 %vm125_vm0, %v1047_v22  ;;  %v1196_v22 = vsub.s32 3, %v3510_v10 }
 0x6e9   :  { %2844 = vmatmul.mubr.msk.f32.vlgmr.msra.gmra.mrb[4].mxu0 %vm125_vm0, %v2834_v42  ;;  %v1191_v42 = vrot.slane %v3515_v13, %v1190_v3 }
 0x6ea   :  { %3024 = vmatpush3.bf16.msra.mxu0 %v3021_v50 }
 0x6eb   :  { %3026 = vmatprep.subr.bf16.mxu0 %v3025_v51 }
 0x6ee   :  { %3028 = vmatpush3.bf16.msra.mxu0 %v3025_v51 }
 0x7bc   :  { %v2845_v24 = vpop.f32.mrb[4].mxu0 }
 0x7bd   :  { %v1156_v25 = vadd.f32 %v2845_v24, %v1061_v7  ;;  %v1150_v11 = vpop.f32.mrb[5].mxu0 }
 0x7be   :  { %v1151_v29 = vadd.f32 %v1150_v11, %v1061_v7  ;;  %v1197_v11 = vrot.slane %v3515_v13, %v1196_v22 }
 0x7bf   :  { %v1160_v17 = vadd.f32 %v1156_v25, %v3506_v8 }
 0x7c0   :  { %v1159_v30 = vadd.f32 %v1151_v29, %v3500_v6 }
 0x7c1   :  { %v1164_v31 = vsel %vm125_vm0, %v1160_v17, 0.0 }
 0x7c2   :  { %1165 = vadd.xlane.f32.xlu1 %v1164_v31  ;;  %v1161_v33 = vsel %vm125_vm0, %v1159_v30, 0.0 }
 0x7c3   :  { %1162 = vadd.xlane.f32.xlu0 %v1161_v33 }
 0x7d3   :  { %3163 = vrot.lane.b32.xlu1 %v3705_v37, %s3389_s13 }
 0x7d7   :  { %1302 = vrot.lane.b32.xlu1 %v1203_v55, %s3389_s13 }
 0x84f   :  { %v1166_v6 = vpop.xlane.xlu1 %1165 }
 0x850   :  { %v1169_v8 = vmul.f32 0.03125, %v1166_v6  ;;  %v1163_v38 = vpop.xlane.xlu0 %1162 }
 0x851   :  { %v1168_v27 = vmul.f32 0.03125, %v1163_v38 }
 0x852   :  { %v1171_v32 = vsub.f32 %v1160_v17, %v1169_v8 }
 0x853   :  { %v1170_v39 = vsub.f32 %v1159_v30, %v1168_v27  ;;  %v3164_v61 = vpop.permute.xlu1 %3163 }
 0x854   :  { %v1173_v34 = vmul.f32 %v1171_v32, %v1171_v32  ;;  %v3166_v45 = vunpack.i.h.bf16 %v3164_v61  ;;  %v3165_v46 = vunpack.i.l.bf16 %v3164_v61 }
 0x855   :  { %v1172_v41 = vmul.f32 %v1170_v39, %v1170_v39 }
 0x856   :  { %v1177_v40 = vsel %vm125_vm0, %v1173_v34, 0.0  ;;  %v3029_v47 = vpack.c.bf16 %v3166_v45, %v3165_v46 }
 0x857   :  { %1178 = vadd.xlane.f32.xlu0 %v1177_v40  ;;  %v1174_v57 = vsel %vm125_vm0, %v1172_v41, 0.0  ;;  %v1303_v31 = vpop.permute.xlu1 %1302 }
 0x858   :  { %3030 = vmatprep.subr.bf16.mxu1 %v3029_v47 }
 0x859   :  { %3032 = vmatpush3.bf16.msra.mxu1 %v3029_v47  ;;  %v120_v47 = vsel %vm3591_vm9, 0.0, %v3390_v56 }
 0x85b   :  { %1175 = vadd.xlane.f32.xlu0 %v1174_v57 }
 0x871   :  { %3168 = vrot.lane.b32.xlu0 %v3717_v48, %s3389_s13 }
 0x8e4   :  { %v1179_v58 = vpop.xlane.xlu0 %1178 }
 0x8e5   :  { %v1181_v59 = vmul.f32 0.03125, %v1179_v58 }
 0x8e7   :  { %v1183_v60 = vadd.f32 1e-05, %v1181_v59 }
 0x8e8   :  { %v1176_v62 = vpop.xlane.xlu0 %1175 }
 0x8e9   :  { %3244 = vrsqrt.f32 %v1183_v60  ;;  %v1180_v4 = vmul.f32 0.03125, %v1176_v62 }
 0x8eb   :  { %v1182_v14 = vadd.f32 1e-05, %v1180_v4 }
 0x8ec   :  { %v3169_v15 = vpop.permute.xlu0 %3168 }
 0x8ed   :  { %3246 = vrsqrt.f32 %v1182_v14  ;;  %v3171_v0 = vunpack.i.h.bf16 %v3169_v15  ;;  %v3170_v1 = vunpack.i.l.bf16 %v3169_v15 }
 0x8ef   :  { %v3033_v2 = vpack.c.bf16 %v3171_v0, %v3170_v1 }
 0x8f1   :  { %3034 = vmatprep.subr.bf16.mxu1 %v3033_v2 }
 0x8f2   :  { %3036 = vmatpush3.bf16.msra.mxu1 %v3033_v2 }
 0x8f3   :  { %v3245_v9 = vpop.eup %3244 }
 0x8f4   :  { %v1187_v21 = vmul.f32 %v3245_v9, %v1171_v32 }
 0x8f5   :  { %2866 = vmatmul.mubr.msk.f32.vlgmr.msra.gmra.mrb[8].mxu1 %vm125_vm0, %v65_v5 }
 0x8f6   :  { %v1193_v25 = vmul.f32 %v1191_v42, %v1187_v21 }
 0x8f7   :  { %v3247_v7 = vpop.eup %3246 }
 0x8f8   :  { %v1186_v24 = vmul.f32 %v3247_v7, %v1170_v39  ;;  %v3736_v30 = vadd.f32 %v1197_v11, %v1193_v25 }
 0x8fa   :  { %v1192_v29 = vmul.f32 %v1191_v42, %v1186_v24 }
 0x8fc   :  { %v3734_v17 = vadd.f32 %v1197_v11, %v1192_v29 }
 0x8fe   :  { %2854 = vmatprep.mubr.msk.f32.mxu0 %vm125_vm0, %v3734_v17 }
 0x8ff   :  { %2855 = vmatmul.mubr.msk.f32.vlgmr.msra.gmra.mrb[6].mxu0 %vm125_vm0, %v3736_v30 }
 0x9c8   :  { %v2867_v33 = vpop.f32.mrb[8].mxu1 }
 0x9c9   :  { %v3742_v35 = vadd.f32 %v2867_v33, %v1303_v31  ;;  %v1377_v36 = vpop.f32.mrb[9].mxu1 }
 0x9ca   :  { %v3744_v6 = vadd.f32 %v1377_v36, %v1303_v31 }
 0x9cc   :  { %v3037_v13 = vpack.c.bf16 %v3742_v35, %v3744_v6 }
 0x9ce   :  { %3039 = vmatprep.subr.msk.bf16.mxu0 %vm3546_vm5, %v3037_v13  ;;  %3045 = vmatprep.subr.msk.bf16.mxu1 %vm3546_vm5, %v3037_v13 }
 0x9cf   :  { %3042 = vmatpush3.bf16.xpose.msk.msra.mxu0 %vm3546_vm5, %v3037_v13  ;;  %3048 = vmatpush3.bf16.xpose.msk.msra.mxu1 %vm3546_vm5, %v3037_v13 }
 0x9d0   :  { %3059 = vmatprep.subr.msk.bf16.mxu1 %vm3546_vm5, %v3037_v13 }
 0x9d2   :  { %v2856_v8 = vpop.f32.mrb[6].mxu0 }
 0x9d3   :  { %v1282_v38 = vadd.f32 %v2856_v8, %v1203_v55  ;;  %v1276_v27 = vpop.f32.mrb[7].mxu0  ;;  %v3172_v8 = vpack.i.bf16 %v3524_v18, %v3527_v19 }
 0x9d4   :  { %v1277_v32 = vadd.f32 %v1276_v27, %v1203_v55 }
 0x9d5   :  { %v1387_v40 = vmul.f32 %v3524_v18, %v1282_v38  ;;  %v1507_v41 = vmul.f32 %v3527_v19, %v1282_v38  ;;  %v1799_v61 = vmul.f32 %v3571_v28, %v1282_v38  ;;  %v2004_v44 = vmul.f32 %v3656_v63, %v1282_v38 }
 0x9d6   :  { %v1386_v39 = vmul.f32 %v3524_v18, %v1277_v32  ;;  %v1506_v34 = vmul.f32 %v3527_v19, %v1277_v32  ;;  %v1798_v57 = vmul.f32 %v3571_v28, %v1277_v32  ;;  %v2003_v43 = vmul.f32 %v3656_v63, %v1277_v32 }
 0x9d8   :  { %2872 = vmatprep.mubr.msk.f32.mxu0 %vm125_vm0, %v1386_v39  ;;  %2879 = vmatprep.mubr.msk.f32.mxu1 %vm125_vm0, %v1506_v34 }
 0x9d9   :  { %2873 = vmatmul.mubr.msk.f32.vlgmr.msra.gmra.mrb[8].mxu0 %vm125_vm0, %v1387_v40  ;;  %2880 = vmatmul.mubr.msk.f32.vlgmr.msra.gmra.mrb[10].mxu1 %vm125_vm0, %v1507_v41 }
 0x9da   :  { %3062 = vmatpush3.bf16.xpose.msk.msra.mxu1 %vm3546_vm5, %v3037_v13  ;;  %2900 = vmatprep.mubr.msk.f32.mxu1 %vm125_vm0, %v1798_v57 }
 0x9db   :  { %3069 = vmatprep.subr.msk.bf16.mxu1 %vm3546_vm5, %v3037_v13 }
 0x9e1   :  { %2901 = vmatmul.mubr.msk.f32.vlgmr.msra.gmra.mrb[12].mxu1 %vm125_vm0, %v1799_v61 }
 0x9e2   :  { %3072 = vmatpush3.bf16.xpose.msk.msra.mxu1 %vm3546_vm5, %v3037_v13  ;;  %2914 = vmatprep.mubr.msk.f32.mxu1 %vm125_vm0, %v2003_v43  ;;  %v3177_v13 = vpack.i.bf16 %v3656_v63, %v3571_v28 }
 0x9e9   :  { %2915 = vmatmul.mubr.msk.f32.vlgmr.msra.gmra.mrb[14].mxu1 %vm125_vm0, %v2004_v44 }
 0xaac   :  { %v2874_v45 = vpop.f32.mrb[8].mxu0  ;;  %v2881_v46 = vpop.f32.mrb[10].mxu1 }
 0xaad   :  { %v1590_v49 = vmul.f32 0.35355338, %v2881_v46  ;;  %v1466_v50 = vpop.f32.mrb[9].mxu0  ;;  %v1580_v51 = vpop.f32.mrb[11].mxu1  ;;  %v1476_v54 = vmul.f32 0.35355338, %v2874_v45 }
 0xaae   :  { %v1475_v55 = vmul.f32 0.35355338, %v1466_v50  ;;  %v1589_v58 = vmul.f32 0.35355338, %v1580_v51 }
 0xaaf   :  { %v3786_v59 = vadd.f32 %v1590_v49, %v120_v47  ;;  %v1478_v14 = vadd.f32 %v1476_v54, %v120_v47 }
 0xab0   :  { %v1591_v60 = vadd.f32 %v1589_v58, %v119_v26  ;;  %v3790_v4 = vadd.f32 %v1475_v55, %v119_v26 }
 0xab1   :  { %v1596_v62 = vsel %vm309_vm15, %v3786_v59, -inf  ;;  %v1482_v2 = vsel %vm309_vm15, %v1478_v14, -inf }
 0xab2   :  { %1597 = vmax.xlane.f32.xlu0 %v1596_v62  ;;  %v1593_v52 = vsel %vm309_vm15, %v1591_v60, -inf  ;;  %v1479_v56 = vsel %vm309_vm15, %v3790_v4, -inf }
 0xab3   :  { %1594 = vmax.xlane.f32.xlu1 %v1593_v52 }
 0xab4   :  { %v2902_v15 = vpop.f32.mrb[12].mxu1 }
 0xab5   :  { %v1882_v0 = vmul.f32 0.35355338, %v2902_v15  ;;  %v1872_v53 = vpop.f32.mrb[13].mxu1 }
 0xab6   :  { %v1881_v1 = vmul.f32 0.35355338, %v1872_v53  ;;  %1480 = vmax.xlane.f32.xlu0 %v1479_v56 }
 0xab7   :  { %1483 = vmax.xlane.f32.xlu1 %v1482_v2  ;;  %v1884_v5 = vadd.f32 %v1882_v0, %v120_v47 }
 0xab8   :  { %v3796_v9 = vadd.f32 %v1881_v1, %v119_v26 }
 0xab9   :  { %v1888_v42 = vsel %vm309_vm15, %v1884_v5, -inf }
 0xaba   :  { %v1885_v21 = vsel %vm309_vm15, %v3796_v9, -inf }
 0xabb   :  { %1886 = vmax.xlane.f32.xlu0 %v1885_v21  ;;  %1889 = vmax.xlane.f32.xlu1 %v1888_v42 }
 0xabc   :  { %v2916_v7 = vpop.f32.mrb[14].mxu1 }
 0xabd   :  { %v2087_v24 = vmul.f32 0.35355338, %v2916_v7  ;;  %v2077_v25 = vpop.f32.mrb[15].mxu1 }
 0xabe   :  { %v2086_v11 = vmul.f32 0.35355338, %v2077_v25 }
 0xabf   :  { %v2089_v29 = vadd.f32 %v2087_v24, %v120_v47 }
 0xac0   :  { %v2088_v31 = vadd.f32 %v2086_v11, %v119_v26 }
 0xac1   :  { %v2093_v33 = vsel %vm309_vm15, %v2089_v29, -inf }
 0xac2   :  { %2094 = vmax.xlane.f32.xlu1 %v2093_v33  ;;  %v2090_v36 = vsel %vm309_vm15, %v2088_v31, -inf }
 0xac3   :  { %2091 = vmax.xlane.f32.xlu0 %v2090_v36 }
 0xad3   :  { %3178 = vrot.lane.b32.xlu1 %v3177_v13, %s3392_s15 }
 0xad9   :  { %3173 = vrot.lane.b32.xlu0 %v3172_v8, %s3392_s15 }
 0xb3f   :  { %v1598_v38 = vpop.xlane.xlu0 %1597 }
 0xb40   :  { %v1595_v27 = vpop.xlane.xlu1 %1594  ;;  %v1600_v56 = vsub.f32 %v3786_v59, %v1598_v38 }
 0xb41   :  { %v1599_v32 = vsub.f32 %v1591_v60, %v1595_v27 }
 0xb42   :  { %v1603_v2 = vmul.f32 1.442695, %v1600_v56 }
 0xb43   :  { %v1481_v40 = vpop.xlane.xlu0 %1480  ;;  %v1601_v41 = vmul.f32 1.442695, %v1599_v32 }
 0xb44   :  { %v1484_v39 = vpop.xlane.xlu1 %1483 }
 0xb45   :  { %v1486_v34 = vsub.f32 %v1478_v14, %v1484_v39 }
 0xb47   :  { %v1489_v57 = vmul.f32 1.442695, %v1486_v34 }
 0xb48   :  { %v1890_v61 = vpop.xlane.xlu1 %1889  ;;  %v1887_v63 = vpop.xlane.xlu0 %1886 }
 0xb49   :  { %3248 = vpow2.f32 %v1489_v57  ;;  %v1892_v43 = vsub.f32 %v1884_v5, %v1890_v61  ;;  %v1485_v5 = vsub.f32 %v3790_v4, %v1481_v40  ;;  %v1891_v42 = vsub.f32 %v3796_v9, %v1887_v63 }
 0xb4a   :  { %3250 = vpow2.f32 %v1601_v41 }
 0xb4b   :  { %v1895_v28 = vmul.f32 1.442695, %v1892_v43  ;;  %v1487_v21 = vmul.f32 1.442695, %v1485_v5  ;;  %v1893_v24 = vmul.f32 1.442695, %v1891_v42 }
 0xb4d   :  { %3252 = vpow2.f32 %v1895_v28 }
 0xb4f   :  { %v2095_v44 = vpop.xlane.xlu1 %2094 }
 0xb50   :  { %v2097_v45 = vsub.f32 %v2089_v29, %v2095_v44  ;;  %v2092_v18 = vpop.xlane.xlu0 %2091 }
 0xb51   :  { %v2096_v19 = vsub.f32 %v2088_v31, %v2092_v18 }
 0xb52   :  { %v2100_v46 = vmul.f32 1.442695, %v2097_v45 }
 0xb53   :  { %v3809_v47 = vpop.eup %3248  ;;  %v2098_v49 = vmul.f32 1.442695, %v2096_v19  ;;  %v3179_v13 = vpop.permute.xlu1 %3178 }
 0xb54   :  { %3254 = vpow2.f32 %v2100_v46  ;;  %v3174_v50 = vpop.permute.xlu0 %3173  ;;  %v1494_v51 = vsel %vm309_vm15, %v3809_v47, 0.0  ;;  %v3813_v26 = vpop.eup %3250  ;;  %v3180_v8 = vunpack.i.l.bf16 %v3179_v13  ;;  %v3181_v38 = vunpack.i.h.bf16 %v3179_v13 }
 0xb55   :  { %v3175_v54 = vunpack.i.l.bf16 %v3174_v50  ;;  %1495 = vadd.xlane.f32.xlu1 %v1494_v51  ;;  %3256 = vpow2.f32 %v2098_v49  ;;  %v1605_v60 = vsel %vm309_vm15, %v3813_v26, 0.0  ;;  %v3176_v7 = vunpack.i.h.bf16 %v3174_v50 }
 0xb56   :  { %3258 = vpow2.f32 %v1603_v2  ;;  %v1910_v27 = vmul.f32 %v3180_v8, %v3744_v6  ;;  %v1911_v32 = vmul.f32 %v3180_v8, %v3742_v35  ;;  %v2115_v39 = vmul.f32 %v3181_v38, %v3744_v6 }
 0xb57   :  { %v1618_v55 = vmul.f32 %v3175_v54, %v3744_v6  ;;  %v1619_v58 = vmul.f32 %v3175_v54, %v3742_v35  ;;  %v3819_v62 = vpop.eup %3252  ;;  %3260 = vpow2.f32 %v1487_v21  ;;  %v1504_v25 = vmul.f32 %v3176_v7, %v3744_v6 }
 0xb58   :  { %v1900_v14 = vsel %vm309_vm15, %v3819_v62, 0.0  ;;  %v1505_v11 = vmul.f32 %v3176_v7, %v3742_v35  ;;  %3262 = vpow2.f32 %v1893_v24  ;;  %v2116_v34 = vmul.f32 %v3181_v38, %v3742_v35 }
 0xb59   :  { %1606 = vadd.xlane.f32.xlu1 %v1605_v60  ;;  %v3182_v52 = vpack.i.bf16 %v1619_v58, %v1618_v55  ;;  %v3192_v40 = vpack.i.bf16 %v1911_v32, %v1910_v27 }
 0xb5a   :  { %v3187_v59 = vpack.i.bf16 %v1505_v11, %v1504_v25  ;;  %v3197_v41 = vpack.i.bf16 %v2116_v34, %v2115_v39  ;;  %v2210_v39 = vsub.s32 5, %v3510_v10  ;;  %v3871_v34 = vld [vmem:[#allocation7] sm:$0xff] }
 0xb5b   :  { %3183 = vrot.lane.b32.xlu0 %v3182_v52, %s3389_s13 }
 0xb5d   :  { %1901 = vadd.xlane.f32.xlu1 %v1900_v14 }
 0xb5e   :  { %v3824_v15 = vpop.eup %3254 }
 0xb5f   :  { %v2105_v0 = vsel %vm309_vm15, %v3824_v15, 0.0  ;;  %v3828_v53 = vpop.eup %3256 }
 0xb60   :  { %v2102_v1 = vsel %vm309_vm15, %v3828_v53, 0.0  ;;  %v3259_v29 = vpop.eup %3258 }
 0xb61   :  { %2106 = vadd.xlane.f32.xlu1 %v2105_v0  ;;  %v1608_v31 = vsel %vm309_vm15, %v3259_v29, 0.0  ;;  %v3261_v33 = vpop.eup %3260 }
 0xb62   :  { %v1491_v4 = vsel %vm309_vm15, %v3261_v33, 0.0  ;;  %v3840_v36 = vpop.eup %3262 }
 0xb63   :  { %v1897_v9 = vsel %vm309_vm15, %v3840_v36, 0.0 }
 0xb65   :  { %2103 = vadd.xlane.f32.xlu1 %v2102_v1 }
 0xb76   :  { %3188 = vrot.lane.b32.xlu1 %v3187_v59, %s3389_s13 }
 0xb7a   :  { %1609 = vadd.xlane.f32.xlu0 %v1608_v31  ;;  %3203 = vrot.lane.b32.xlu1 %v3705_v37, %s3392_s15 }
 0xb7e   :  { %1492 = vadd.xlane.f32.xlu0 %v1491_v4 }
 0xb82   :  { %1898 = vadd.xlane.f32.xlu0 %v1897_v9 }
 0xb98   :  { %3193 = vrot.lane.b32.xlu0 %v3192_v40, %s3389_s13  ;;  %v2211_v40 = vrot.slane %v3871_v34, %v2210_v39  ;;  %v67_v39 = vld [vmem:[#allocation7 + $0x8] sm:$0xf] }
 0xb9c   :  { %3198 = vrot.lane.b32.xlu0 %v3197_v41, %s3389_s13 }
 0xba0   :  { %3208 = vrot.lane.b32.xlu0 %v3717_v48, %s3392_s15 }
 0xbcd   :  { %v3184_v57 = vpop.permute.xlu0 %3183 }
 0xbce   :  { %v3186_v61 = vunpack.i.h.bf16 %v3184_v57  ;;  %v3185_v43 = vunpack.i.l.bf16 %v3184_v57 }
 0xbd0   :  { %v3049_v28 = vpack.c.bf16 %v3186_v61, %v3185_v43 }
 0xbd2   :  { %3050 = vmatprep.subr.bf16.mxu0 %v3049_v28 }
 0xbd3   :  { %3052 = vmatpush3.bf16.msra.mxu0 %v3049_v28 }
 0xbe2   :  { %v1496_v6 = vpop.xlane.xlu1 %1495 }
 0xbe6   :  { %v1607_v35 = vpop.xlane.xlu1 %1606 }
 0xbe7   :  { %3264 = vrcp.f32 %v1607_v35 }
 0xbea   :  { %v1902_v63 = vpop.xlane.xlu1 %1901 }
 0xbee   :  { %v2107_v44 = vpop.xlane.xlu1 %2106 }
 0xbf1   :  { %v3265_v45 = vpop.eup %3264 }
 0xbf2   :  { %v2104_v18 = vpop.xlane.xlu1 %2103  ;;  %v1613_v19 = vmul.f32 %v3265_v45, %v3813_v26 }
 0xbf4   :  { %2886 = vmatprep.mubr.msk.f32.mxu0 %vm309_vm15, %v1613_v19 }
 0xbf6   :  { %v3189_v37 = vpop.permute.xlu1 %3188 }
 0xbf7   :  { %v3191_v46 = vunpack.i.h.bf16 %v3189_v37  ;;  %v3190_v48 = vunpack.i.l.bf16 %v3189_v37 }
 0xbf9   :  { %v3053_v49 = vpack.c.bf16 %v3191_v46, %v3190_v48 }
 0xbfb   :  { %3054 = vmatprep.subr.bf16.mxu0 %v3053_v49 }
 0xc07   :  { %v1610_v50 = vpop.xlane.xlu0 %1609 }
 0xc08   :  { %3266 = vrcp.f32 %v1610_v50  ;;  %v77_v50 = vld [vmem:[%s3959_s2 + $0x28] sm:$0xff] }
 0xc0b   :  { %v1493_v51 = vpop.xlane.xlu0 %1492 }
 0xc0c   :  { %3268 = vrcp.f32 %v1493_v51 }
 0xc0d   :  { %3270 = vrcp.f32 %v1496_v6 }
 0xc0f   :  { %v1899_v54 = vpop.xlane.xlu0 %1898 }
 0xc10   :  { %3272 = vrcp.f32 %v1899_v54  ;;  %v78_v54 = vld [vmem:[%s3959_s2 + $0x40] sm:$0xff] }
 0xc11   :  { %3274 = vrcp.f32 %v1902_v63 }
 0xc12   :  { %v3267_v55 = vpop.eup %3266  ;;  %3276 = vrcp.f32 %v2104_v18 }
 0xc13   :  { %v1614_v58 = vmul.f32 %v3267_v55, %v3259_v29  ;;  %v3194_v60 = vpop.permute.xlu0 %3193  ;;  %3278 = vrcp.f32 %v2107_v44  ;;  %v3204_v29 = vpop.permute.xlu1 %3203  ;;  %v79_v55 = vld [vmem:[%s3959_s2 + $0x58] sm:$0xff] }
 0xc14   :  { %v3196_v52 = vunpack.i.h.bf16 %v3194_v60  ;;  %v3195_v14 = vunpack.i.l.bf16 %v3194_v60  ;;  %v3206_v31 = vunpack.i.h.bf16 %v3204_v29  ;;  %v80_v60 = vld [vmem:[%s3960_s3] sm:$0xff] }
 0xc15   :  { %2887 = vmatmul.mubr.msk.f32.vlgmr.msra.gmra.mrb[10].mxu0 %vm309_vm15, %v1614_v58  ;;  %v3089_v58 = vpack.c.bf16 %v79_v55, %v78_v54 }
 0xc16   :  { %v3269_v26 = vpop.eup %3268  ;;  %v3063_v0 = vpack.c.bf16 %v3196_v52, %v3195_v14  ;;  %3056 = vmatpush3.bf16.msra.mxu0 %v3053_v49  ;;  %v81_v52 = vld [vmem:[%s3960_s3 + $0x8] sm:$0xff]  ;;  %v82_v14 = vld [vmem:[%s3960_s3 + $0x10] sm:$0xff] }
 0xc17   :  { %v3199_v56 = vpop.permute.xlu0 %3198  ;;  %v1499_v1 = vmul.f32 %v3269_v26, %v3261_v33  ;;  %v3271_v2 = vpop.eup %3270  ;;  %v3205_v33 = vunpack.i.l.bf16 %v3204_v29  ;;  %v3093_v26 = vpack.c.bf16 %v81_v52, %v80_v60  ;;  %v2341_v29 = vsub.s32 7, %v3510_v10 }
 0xc18   :  { %3064 = vmatprep.subr.bf16.mxu0 %v3063_v0  ;;  %v3201_v5 = vunpack.i.h.bf16 %v3199_v56  ;;  %v3200_v21 = vunpack.i.l.bf16 %v3199_v56  ;;  %v1500_v7 = vmul.f32 %v3271_v2, %v3809_v47  ;;  %v85_v2 = vld [vmem:[%s3960_s3 + $0x28] sm:$0xff] }
 0xc19   :  { %2893 = vmatprep.mubr.msk.f32.mxu0 %vm309_vm15, %v1499_v1  ;;  %v3077_v47 = vpack.c.bf16 %v3206_v31, %v3205_v33  ;;  %v84_v1 = vld [vmem:[%s3960_s3 + $0x20] sm:$0xff] }
 0xc1a   :  { %v3273_v42 = vpop.eup %3272  ;;  %v3073_v25 = vpack.c.bf16 %v3201_v5, %v3200_v21  ;;  %v3101_v5 = vpack.c.bf16 %v85_v2, %v84_v1 }
 0xc1b   :  { %v1905_v24 = vmul.f32 %v3273_v42, %v3840_v36  ;;  %v3275_v11 = vpop.eup %3274  ;;  %v3209_v13 = vpop.permute.xlu0 %3208 }
 0xc1c   :  { %v3277_v59 = vpop.eup %3276  ;;  %v1906_v4 = vmul.f32 %v3275_v11, %v3819_v62  ;;  %v3211_v36 = vunpack.i.h.bf16 %v3209_v13  ;;  %v3210_v8 = vunpack.i.l.bf16 %v3209_v13  ;;  %v2342_v13 = vrot.slane %v3871_v34, %v2341_v29 }
 0xc1d   :  { %2894 = vmatmul.mubr.msk.f32.vlgmr.msra.gmra.mrb[10].mxu0 %vm309_vm15, %v1500_v7  ;;  %v2110_v9 = vmul.f32 %v3277_v59, %v3828_v53  ;;  %v3279_v38 = vpop.eup %3278  ;;  %v2335_v59 = vsub.s32 6, %v3510_v10 }
 0xc1e   :  { %3066 = vmatpush3.bf16.msra.mxu0 %v3063_v0  ;;  %2907 = vmatprep.mubr.msk.f32.mxu0 %vm309_vm15, %v1905_v24  ;;  %v2111_v27 = vmul.f32 %v3279_v38, %v3824_v15  ;;  %v3081_v32 = vpack.c.bf16 %v3211_v36, %v3210_v8  ;;  %v83_v0 = vld [vmem:[%s3960_s3 + $0x18] sm:$0xff] }
 0xc1f   :  { %3074 = vmatprep.subr.bf16.mxu0 %v3073_v25  ;;  %v3097_v56 = vpack.c.bf16 %v83_v0, %v82_v14  ;;  %v2336_v31 = vrot.slane %v3871_v34, %v2335_v59  ;;  %v2348_v34 = vrot.slane %v67_v39, %v123_v12 }
 0xc25   :  { %2908 = vmatmul.mubr.msk.f32.vlgmr.msra.gmra.mrb[10].mxu0 %vm309_vm15, %v1906_v4 }
 0xc26   :  { %3076 = vmatpush3.bf16.msra.mxu0 %v3073_v25  ;;  %2921 = vmatprep.mubr.msk.f32.mxu0 %vm309_vm15, %v2110_v9 }
 0xc27   :  { %3078 = vmatprep.subr.bf16.mxu0 %v3077_v47 }
 0xc2d   :  { %2922 = vmatmul.mubr.msk.f32.vlgmr.msra.gmra.mrb[10].mxu0 %vm309_vm15, %v2111_v27 }
 0xc2e   :  { %3080 = vmatpush3.bf16.msra.mxu0 %v3077_v47 }
 0xc2f   :  { %3082 = vmatprep.subr.bf16.mxu0 %v3081_v32 }
 0xc32   :  { %3084 = vmatpush3.bf16.msra.mxu0 %v3081_v32  ;;  %v86_v32 = vld [vmem:[%s3960_s3 + $0x30] sm:$0xff] }
 0xc33   :  { %3094 = vmatprep.subr.bf16.mxu0 %v3093_v26 }
 0xd00   :  { %v2923_v62 = vpop.f32.mrb[10].mxu0 }
 0xd01   :  { %v2197_v53 = vpop.f32.mrb[11].mxu0 }
 0xd02   :  { %2932 = vmatprep.mubr.msk.f32.mxu0 %vm125_vm0, %v2197_v53 }
 0xd03   :  { %2933 = vmatmul.mubr.msk.f32.vlgmr.msra.gmra.mrb[12].mxu0 %vm125_vm0, %v2923_v62  ;;  %v87_v62 = vld [vmem:[%s3960_s3 + $0x38] sm:$0xff]  ;;  %s3393_s3 = smov [#allocation8]  }
 0xd04   :  { %3096 = vmatpush3.bf16.msra.mxu0 %v3093_v26  ;;  %v3105_v53 = vpack.c.bf16 %v87_v62, %v86_v32 }
 0xd05   :  { %3098 = vmatprep.subr.bf16.mxu0 %v3097_v56 }
 0xd08   :  { %3100 = vmatpush3.bf16.msra.mxu0 %v3097_v56 }
 0xd09   :  { %3102 = vmatprep.subr.bf16.mxu0 %v3101_v5 }
 0xd0c   :  { %3104 = vmatpush3.bf16.msra.mxu0 %v3101_v5 }
 0xd0d   :  { %3106 = vmatprep.subr.bf16.mxu0 %v3105_v53 }
 0xd10   :  { %3108 = vmatpush3.bf16.msra.mxu0 %v3105_v53 }
 0xdd6   :  { %v2934_v41 = vpop.f32.mrb[12].mxu0 }
 0xdd7   :  { %v2302_v15 = vadd.f32 %v2934_v41, %v2211_v40  ;;  %v2296_v57 = vpop.f32.mrb[13].mxu0 }
 0xdd8   :  { %v2297_v61 = vadd.f32 %v2296_v57, %v2211_v40 }
 0xdd9   :  { %v2306_v43 = vadd.f32 %v2302_v15, %v3736_v30 }
 0xdda   :  { %v2305_v28 = vadd.f32 %v2297_v61, %v3734_v17  ;;  %v76_v17 = vld [vmem:[%s3959_s2 + $0x10] sm:$0xff] }
 0xddb   :  { %v2310_v6 = vsel %vm125_vm0, %v2306_v43, 0.0  ;;  %v3085_v51 = vpack.c.bf16 %v77_v50, %v76_v17 }
 0xddc   :  { %2311 = vadd.xlane.f32.xlu0 %v2310_v6  ;;  %v2307_v35 = vsel %vm125_vm0, %v2305_v28, 0.0 }
 0xddd   :  { %2308 = vadd.xlane.f32.xlu1 %v2307_v35  ;;  %3086 = vmatprep.subr.bf16.mxu1 %v3085_v51 }
 0xdde   :  { %3088 = vmatpush3.bf16.msra.mxu1 %v3085_v51 }
 0xddf   :  { %3090 = vmatprep.subr.bf16.mxu1 %v3089_v58 }
 0xde2   :  { %3092 = vmatpush3.bf16.msra.mxu1 %v3089_v58 }
 0xe69   :  { %v2312_v63 = vpop.xlane.xlu0 %2311 }
 0xe6a   :  { %v2314_v44 = vmul.f32 0.03125, %v2312_v63  ;;  %v2309_v45 = vpop.xlane.xlu1 %2308 }
 0xe6b   :  { %v2313_v18 = vmul.f32 0.03125, %v2309_v45 }
 0xe6c   :  { %v2316_v19 = vsub.f32 %v2306_v43, %v2314_v44 }
 0xe6d   :  { %v2315_v37 = vsub.f32 %v2305_v28, %v2313_v18  ;;  %v2435_v28 = vrot.slane %v67_v39, %v1060_v16 }
 0xe6e   :  { %v2318_v46 = vmul.f32 %v2316_v19, %v2316_v19 }
 0xe6f   :  { %v2317_v48 = vmul.f32 %v2315_v37, %v2315_v37 }
 0xe70   :  { %v2322_v49 = vsel %vm125_vm0, %v2318_v46, 0.0 }
 0xe71   :  { %2323 = vadd.xlane.f32.xlu1 %v2322_v49  ;;  %v2319_v30 = vsel %vm125_vm0, %v2317_v48, 0.0 }
 0xe72   :  { %2320 = vadd.xlane.f32.xlu0 %v2319_v30 }
 0xefe   :  { %v2324_v21 = vpop.xlane.xlu1 %2323 }
 0xeff   :  { %v2326_v42 = vmul.f32 0.03125, %v2324_v21  ;;  %v2321_v7 = vpop.xlane.xlu0 %2320 }
 0xf00   :  { %v2325_v24 = vmul.f32 0.03125, %v2321_v7 }
 0xf01   :  { %v2328_v25 = vadd.f32 1e-05, %v2326_v42 }
 0xf02   :  { %v2327_v11 = vadd.f32 1e-05, %v2325_v24 }
 0xf03   :  { %3280 = vrsqrt.f32 %v2328_v25 }
 0xf04   :  { %3282 = vrsqrt.f32 %v2327_v11 }
 0xf0d   :  { %v3281_v33 = vpop.eup %3280 }
 0xf0e   :  { %v3283_v4 = vpop.eup %3282  ;;  %v2332_v9 = vmul.f32 %v3281_v33, %v2316_v19 }
 0xf0f   :  { %v2331_v47 = vmul.f32 %v3283_v4, %v2315_v37 }
 0xf10   :  { %v2338_v36 = vmul.f32 %v2336_v31, %v2332_v9 }
 0xf11   :  { %v2337_v8 = vmul.f32 %v2336_v31, %v2331_v47 }
 0xf12   :  { %v2344_v27 = vadd.f32 %v2342_v13, %v2338_v36 }
 0xf13   :  { %v2343_v38 = vadd.f32 %v2342_v13, %v2337_v8 }
 0xf15   :  { %2943 = vmatprep.mubr.msk.f32.mxu1 %vm125_vm0, %v2343_v38 }
 0xf16   :  { %2944 = vmatmul.mubr.msk.f32.vlgmr.msra.gmra.mrb[16].mxu1 %vm125_vm0, %v2344_v27 }
 0xfe9   :  { %v2945_v40 = vpop.f32.mrb[16].mxu1 }
 0xfea   :  { %v2427_v41 = vadd.f32 %v2945_v40, %v2348_v34  ;;  %v2421_v15 = vpop.f32.mrb[17].mxu1 }
 0xfeb   :  { %v2422_v57 = vadd.f32 %v2421_v15, %v2348_v34 }
 0xfec   :  { %v2431_v43 = vmax.f32 %v2427_v41, 0.0 }
 0xfed   :  { %v2430_v61 = vmax.f32 %v2422_v57, 0.0 }
 0xfef   :  { %2962 = vmatprep.mubr.msk.f32.mxu0 %vm2436_vm4, %v2430_v61 }
 0xff0   :  { %2963 = vmatmul.mubr.msk.f32.vlgmr.msra.gmra.mrb[14].mxu0 %vm2436_vm4, %v2431_v43 }
0x10c3   :  { %v2964_v6 = vpop.f32.mrb[14].mxu0 }
0x10c4   :  { %v2515_v35 = vadd.f32 %v2964_v6, %v2435_v28  ;;  %v2509_v63 = vpop.f32.mrb[15].mxu0 }
0x10c5   :  { %v2510_v44 = vadd.f32 %v2509_v63, %v2435_v28 }
0x10c6   :  { %v2519_v45 = vadd.f32 %v2515_v35, %v2344_v27 }
0x10c7   :  { %v2518_v18 = vadd.f32 %v2510_v44, %v2343_v38 }
0x10c8   :  { %v2523_v12 = vsel %vm125_vm0, %v2519_v45, 0.0 }
0x10c9   :  { %2524 = vadd.xlane.f32.xlu1 %v2523_v12  ;;  %v2520_v19 = vsel %vm125_vm0, %v2518_v18, 0.0 }
0x10ca   :  { %2521 = vadd.xlane.f32.xlu0 %v2520_v19 }
0x1156   :  { %v2525_v37 = vpop.xlane.xlu1 %2524 }
0x1157   :  { %v2527_v46 = vmul.f32 0.03125, %v2525_v37  ;;  %v2522_v48 = vpop.xlane.xlu0 %2521 }
0x1158   :  { %v2526_v49 = vmul.f32 0.03125, %v2522_v48 }
0x1159   :  { %v2529_v30 = vsub.f32 %v2519_v45, %v2527_v46 }
0x115a   :  { %v2528_v17 = vsub.f32 %v2518_v18, %v2526_v49 }
0x115b   :  { %v2531_v50 = vmul.f32 %v2529_v30, %v2529_v30 }
0x115c   :  { %v2530_v16 = vmul.f32 %v2528_v17, %v2528_v17 }
0x115d   :  { %v2535_v51 = vsel %vm125_vm0, %v2531_v50, 0.0 }
0x115e   :  { %2536 = vadd.xlane.f32.xlu1 %v2535_v51  ;;  %v2532_v54 = vsel %vm125_vm0, %v2530_v16, 0.0 }
0x115f   :  { %2533 = vadd.xlane.f32.xlu0 %v2532_v54 }
0x116f   :  { %2567 = vrot.lane.b32.xlu1 %v3537_v23, %s3391_s14  ;;  %v2549_v23 = vrot.slane %v67_v39, %v1190_v3 }
0x1175   :  { %2565 = vrot.lane.b32.xlu0 %v3529_v20, %s3391_s14  ;;  %v2555_v20 = vrot.slane %v67_v39, %v1196_v22  ;;  %s2579_s14 = sshll.u32 %s3393_s3, 4  ;;  %s2580_s14 = int_to_ptr.vmem [resolvable:$true] %s2579_s14 }
0x1176   :  { %s3355_s22 = scalar_lea.vmem %s2580_s14, 768  ;;  %p3360_p11 = scmp.lt.s32.totalorder %s2580_s14, %s2580_s14 }
0x1177   :  { %p3356_p10 = scmp.ne.s32.totalorder %s2580_s14, %s3355_s22  ;;  %p3361_p12 = scmp.lt.s32.totalorder %s3355_s22, %s3355_s22 }
0x1179   :  { %p3362_p13 = por %p3361_p12, %p3360_p11 }
0x117b   :  { %p3363_p0 = pnand %p3362_p13, %p3356_p10 }
0x11eb   :  { %v2537_v55 = vpop.xlane.xlu1 %2536 }
0x11ec   :  { %v2539_v58 = vmul.f32 0.03125, %v2537_v55  ;;  %v2534_v60 = vpop.xlane.xlu0 %2533 }
0x11ed   :  { %v2538_v52 = vmul.f32 0.03125, %v2534_v60 }
0x11ee   :  { %v2541_v14 = vadd.f32 1e-05, %v2539_v58 }
0x11ef   :  { %v2540_v26 = vadd.f32 1e-05, %v2538_v52  ;;  %v2568_v0 = vpop.permute.xlu1 %2567 }
0x11f0   :  { %3284 = vrsqrt.f32 %v2541_v14  ;;  %2573 = vst.msk [vmem:[#allocation8 + $0x28] sm:$0xff] %vm125_vm0, %v2568_v0  ;;  %v2566_v56 = vpop.permute.xlu0 %2565 }
0x11f1   :  { %3286 = vrsqrt.f32 %v2540_v26  ;;  %2572 = vst.msk [vmem:[#allocation8 + $0x20] sm:$0xff] %vm125_vm0, %v2566_v56 }
0x11fa   :  { %v3285_v1 = vpop.eup %3284 }
0x11fb   :  { %v3287_v2 = vpop.eup %3286  ;;  %v2545_v5 = vmul.f32 %v3285_v1, %v2529_v30 }
0x11fc   :  { %v2544_v21 = vmul.f32 %v3287_v2, %v2528_v17 }
0x11fd   :  { %v2551_v42 = vmul.f32 %v2549_v23, %v2545_v5 }
0x11fe   :  { %v2550_v7 = vmul.f32 %v2549_v23, %v2544_v21 }
0x11ff   :  { %v2557_v24 = vadd.f32 %v2555_v20, %v2551_v42 }
0x1200   :  { %v2556_v25 = vadd.f32 %v2555_v20, %v2550_v7 }
0x1201   :  { %2559 = vst.msk [vmem:[#allocation8 + $0x8] sm:$0xff] %vm125_vm0, %v2557_v24 }
0x1202   :  { %2558 = vst.msk [vmem:[#allocation8] sm:$0xff] %vm125_vm0, %v2556_v25 }
0x1203   :  { %3366 = shalt.err (!%p3363_p0)
}
0x1204   :  { %s3367_s25 = scalar_lea.hbm %s3962_s5, 768 }
0x1205   :  { %p3368_p1 = scmp.ne.s32.totalorder %s3962_s5, %s3367_s25  ;;  %p3371_p2 = scmp.lt.u32.totalorder %s3367_s25, %s3962_s5 }
0x1207   :  { %p3373_p3 = pnand %p3371_p2, %p3368_p1 }
0x1209   :  { %3376 = shalt.err (!%p3373_p3)
}
0x120a   :  { %2585 = dma.vmem_to_hbm [thread:$0]  %s2580_s14, 768, %s3962_s5, [#allocation4], %s3385_s30, %s3385_s30, %s3386_s6  }
0x120b   :  { %3381 = dma.done.wait [#allocation4], 768  }
0x120c   :  { %3382 = vsyncadd [#allocation4], 4294966528 }
0x120d   :  { %2589 = vsyncpa [#allocation3], 1 }
0x120e   :  { %2590 = vsyncpa [#allocation6], 1 }
0x120f   :  { %2591 = vsyncpa [#allocation4], 1 }

</bundles_post_ra>
